<compile_context>
chip_gen: v6e
topology: v6e:2x2x1
jax: 0.10.0
libtpu: 0.0.40
codegen_flags: <defaults>
</compile_context>

<pallas_src>
import functools

import jax
import jax.numpy as jnp
from jax.experimental import pallas as pl
from jax.experimental.pallas import tpu as pltpu


# ----------------------------- fused Pallas kernel ------------------------- #

def _gnn_kernel(x_ref, lin_w_ref, lin_b_ref, sdst_ref, ssrc_ref, adjb_ref,
                ealpha_ref, w_ref, asrc_m_ref, adst_m_ref, pp_ref, sel_ref,
                fc1w_ref, fc1b_ref, fc2w_ref, fc2b_ref,
                o_ref,
                h_ref, hnew_ref, xpst_ref, asrcT_ref, adst_ref,
                *, heads, hidden, dst_tile, n_real, n_pad, num_layers,
                num_tiles):
    l = pl.program_id(0)          # layer index        (outer, sequential)
    t = pl.program_id(1)          # dst-row tile index (inner, sequential)
    c = hidden

    # -------- one-time init: h0 = relu(x @ W + b); padded rows forced to 0 --------
    @pl.when((l == 0) & (t == 0))
    def _():
        h0 = jnp.maximum(
            jnp.dot(x_ref[...], lin_w_ref[...],
                    preferred_element_type=jnp.float32) + lin_b_ref[...], 0.0)
        rows = jax.lax.broadcasted_iota(jnp.int32, (n_pad, 1), 0)
        h_ref[...] = jnp.where(rows < n_real, h0, 0.0)

    # -------- per-layer prologue (t == 0): BN + projections + attn scalars --------
    @pl.when(t == 0)
    def _():
        h = h_ref[...]                                              # [N, C]
        # BatchNorm1d, training-mode batch stats over the n_real valid rows.
        # Padded rows are exactly zero, so correct them out of the variance.
        mean = jnp.sum(h, axis=0, keepdims=True) * (1.0 / n_real)
        ssq = jnp.sum((h - mean) ** 2, axis=0, keepdims=True)
        var = (ssq - float(n_pad - n_real) * mean * mean) * (1.0 / n_real)
        pp = pp_ref[0]                                              # [8, C]
        xbn = (h - mean) * jax.lax.rsqrt(var + 1e-5) * pp[0:1, :] + pp[1:2, :]

        # all heads in one wide matmul; stack per-head blocks along rows so the
        # later aggregation is a plain [tile, N] x [N, C] matmul per head.
        xp = jnp.dot(xbn, w_ref[0], preferred_element_type=jnp.float32)  # [N, H*C]
        xpst_ref[...] = jnp.concatenate(
            [xp[:, hh * c:(hh + 1) * c] for hh in range(heads)], axis=0)  # [H*N, C]

        # per-node attention scalars for ALL heads via one MXU matmul each
        # (block-diagonal att matrices) instead of heads XLU lane reductions.
        asrcT_ref[...] = jnp.dot(xp, asrc_m_ref[0],
                                 preferred_element_type=jnp.float32).T    # [HP, N]
        adst_ref[...] = jnp.dot(xp, adst_m_ref[0],
                                preferred_element_type=jnp.float32)       # [N, HP]

    # -------------------------- per-dst-tile attention ---------------------------
    sd = sdst_ref[...]                                    # [tile, E_tot] bf16 one-hot
    ealpha = ealpha_ref[0]                                # [HP, E_tot]   bf16
    # fused per-head edge scatter: scale sdst's edge columns by each head's
    # per-edge alpha, stack heads along rows, ONE bf16 MXU matmul against ssrc.
    scaled = jnp.concatenate(
        [sd * ealpha[hh:hh + 1, :] for hh in range(heads)], axis=0)  # [H*tile, E]
    ae_all = jnp.dot(scaled, ssrc_ref[...],
                     preferred_element_type=jnp.float32)              # [H*tile, N]

    row0 = pl.multiple_of(t * dst_tile, dst_tile)
    adst_t = adst_ref[pl.ds(row0, dst_tile), :]                       # [tile, HP]
    bias_t = adjb_ref[...].astype(jnp.float32)                        # [tile, N]
    conv_b = pp_ref[0][2:3, :]                                        # [1, C]

    acc = jnp.zeros((dst_tile, c), jnp.float32)
    for hh in range(heads):                                           # static unroll
        e = (adst_t[:, hh:hh + 1] + asrcT_ref[hh:hh + 1, :]
             + ae_all[hh * dst_tile:(hh + 1) * dst_tile, :])          # [tile, N] fp32
        e = jnp.where(e >= 0.0, e, 0.2 * e) + bias_t                  # leaky_relu+mask
        m = jnp.max(e, axis=-1, keepdims=True)
        p = jnp.exp(e - m)                                            # unnormalized
        denom = jnp.sum(p, axis=-1, keepdims=True)
        agg = jnp.dot(p, xpst_ref[hh * n_pad:(hh + 1) * n_pad, :],
                      preferred_element_type=jnp.float32)             # [tile, C]
        # deferred softmax normalization: scale [tile, C], not [tile, N]
        acc = acc + agg * pl.reciprocal(denom)

    rows = jax.lax.broadcasted_iota(jnp.int32, (dst_tile, 1), 0) + row0
    h_new = jnp.maximum(acc * (1.0 / heads) + conv_b, 0.0)            # head-mean+bias
    hnew_ref[pl.ds(row0, dst_tile), :] = jnp.where(rows < n_real, h_new, 0.0)

    # -------- end of layer: commit h for the next layer --------
    @pl.when((t == num_tiles - 1) & (l < num_layers - 1))
    def _():
        h_ref[...] = hnew_ref[...]

    # -------- final grid point: global_add_pool + FC head (lane-dense store) --------
    @pl.when((t == num_tiles - 1) & (l == num_layers - 1))
    def _():
        g = jnp.dot(sel_ref[...], hnew_ref[...], preferred_element_type=jnp.float32)
        g = jnp.maximum(
            jnp.dot(g, fc1w_ref[...], preferred_element_type=jnp.float32)
            + fc1b_ref[...], 0.0)
        g = jnp.maximum(
            jnp.dot(g, fc2w_ref[...], preferred_element_type=jnp.float32)
            + fc2b_ref[...], 0.0)
        o_ref[...] = g                                               # [G, 128]


# ------------------------------ model forward ------------------------------ #

def _round_up(v, m):
    return (v + m - 1) // m * m


@functools.partial(jax.jit, static_argnames=("num_graphs", "heads", "dst_tile"))
def gnn_forward(params, x, edge_index, edge_attr, batch, *, num_graphs, heads,
                dst_tile=16):
    n = x.shape[0]
    node_f = x.shape[1]
    edge_f = edge_attr.shape[1]
    hidden = params["lin_w"].shape[1]
    num_layers = len(params["conv"])
    hc = heads * hidden
    hp = _round_up(heads, 8)                 # heads padded to one sublane group
    out_dim = params["fc"][1]["w"].shape[1]
    out_pad = 128

    n_pad = _round_up(n, dst_tile)
    num_tiles = n_pad // dst_tile

    # ---------------- one-time graph prep (fused into the same XLA program) -------
    src_e, dst_e = edge_index[0], edge_index[1]

    # PyG add_self_loops(fill_value='mean'): per-destination mean of incoming attrs
    deg = jnp.zeros((n,), jnp.float32).at[dst_e].add(1.0)
    sums = jnp.zeros((n, edge_f), jnp.float32).at[dst_e].add(edge_attr)
    loop_attr = sums / jnp.maximum(deg, 1.0)[:, None]
    ea_full = jnp.concatenate([edge_attr, loop_attr], axis=0)          # [E_tot, De]

    self_idx = jnp.arange(n, dtype=jnp.int32)
    src_full = jnp.concatenate([src_e, self_idx])
    dst_full = jnp.concatenate([dst_e, self_idx])
    e_tot = ea_full.shape[0]

    ids = jnp.arange(n_pad, dtype=jnp.int32)
    sdst = (dst_full[None, :] == ids[:, None]).astype(jnp.bfloat16)    # [N_pad, E_tot]
    ssrc = (src_full[:, None] == ids[None, :]).astype(jnp.bfloat16)    # [E_tot, N_pad]

    # adjacency additive mask built once here (no per-layer MXU flops in-kernel)
    adj = jnp.zeros((n_pad, n_pad), jnp.float32).at[dst_full, src_full].add(1.0)
    adjb = jnp.where(adj > 0.0, 0.0, -1e30).astype(jnp.bfloat16)       # [N_pad, N_pad]

    batch_pad = jnp.full((n_pad,), -1, jnp.int32).at[:n].set(batch.astype(jnp.int32))
    sel = (batch_pad[None, :] == jnp.arange(num_graphs, dtype=jnp.int32)[:, None]
           ).astype(jnp.float32)                                        # [G, N_pad]

    x_pad = jnp.zeros((n_pad, node_f), jnp.float32).at[:n, :].set(x)

    # ---------------- parameter packing (heads folded / block-diagonal att) -------
    w_all = jnp.stack([lp["w_src"].transpose(1, 0, 2).reshape(hidden, hc)
                       for lp in params["conv"]])                       # [L, C, H*C]

    def head_block(att):     # [heads, C] -> block-diagonal [heads*C, HP]
        m = jnp.zeros((hc, hp), jnp.float32)
        for h in range(heads):
            m = m.at[h * hidden:(h + 1) * hidden, h].set(att[h])
        return m

    asrc_m = jnp.stack([head_block(lp["att_src"]) for lp in params["conv"]])
    adst_m = jnp.stack([head_block(lp["att_dst"]) for lp in params["conv"]])

    # per-edge/per-head edge-attention term: layer-constant, precomputed here
    # ealphaT[l, h, e] = sum_c (ea_full @ w_edge[l,h])[e,c] * att_edge[l,h,c]
    ealphaT = jnp.stack([
        jnp.einsum('ed,hdc,hc->he', ea_full, lp["w_edge"], lp["att_edge"])
        for lp in params["conv"]])                                      # [L, heads, E]
    ealphaT = jnp.pad(ealphaT, ((0, 0), (0, hp - heads), (0, 0))
                      ).astype(jnp.bfloat16)                            # [L, HP, E]

    pp = jnp.stack([
        jnp.pad(jnp.stack([lp["bn_w"], lp["bn_b"], lp["bias"]]), ((0, 5), (0, 0)))
        for lp in params["conv"]])                                      # [L, 8, C]

    fc1_w = params["fc"][0]["w"]
    fc1_b = params["fc"][0]["b"].reshape(1, -1)
    fc2_w = jnp.pad(params["fc"][1]["w"], ((0, 0), (0, out_pad - out_dim)))
    fc2_b = jnp.pad(params["fc"][1]["b"].reshape(1, -1),
                    ((0, 0), (0, out_pad - out_dim)))

    # ---------------- BlockSpecs -----------------------------------------------
    def _const_spec(shape):
        zeros = (0,) * len(shape)
        return pl.BlockSpec(tuple(shape), lambda l, t, _z=zeros: _z)

    def _tile_spec(ncols):
        return pl.BlockSpec((dst_tile, ncols), lambda l, t: (t, 0))

    def _layer_spec(full_shape):
        tail = tuple(full_shape[1:])
        zeros = (0,) * len(tail)
        return pl.BlockSpec((1,) + tail, lambda l, t, _z=zeros: (l,) + _z)

    kernel = functools.partial(
        _gnn_kernel, heads=heads, hidden=hidden, dst_tile=dst_tile,
        n_real=n, n_pad=n_pad, num_layers=num_layers, num_tiles=num_tiles)

    out = pl.pallas_call(
        kernel,
        grid=(num_layers, num_tiles),
        in_specs=[
            _const_spec((n_pad, node_f)),            # x
            _const_spec((node_f, hidden)),           # lin_w
            _const_spec((1, hidden)),                # lin_b
            _tile_spec(e_tot),                       # sdst   (bf16, dst-tiled)
            _const_spec((e_tot, n_pad)),             # ssrc   (bf16, resident)
            _tile_spec(n_pad),                       # adj additive mask (bf16)
            _layer_spec((num_layers, hp, e_tot)),    # ealphaT
            _layer_spec((num_layers, hidden, hc)),   # w_all
            _layer_spec((num_layers, hc, hp)),       # asrc_m
            _layer_spec((num_layers, hc, hp)),       # adst_m
            _layer_spec((num_layers, 8, hidden)),    # bn_w / bn_b / conv bias
            _const_spec((num_graphs, n_pad)),        # sel (pooling one-hot)
            _const_spec((hidden, hidden)),           # fc1_w
            _const_spec((1, hidden)),                # fc1_b
            _const_spec((hidden, out_pad)),          # fc2_w (lane-padded)
            _const_spec((1, out_pad)),               # fc2_b
        ],
        out_specs=pl.BlockSpec((num_graphs, out_pad), lambda l, t: (0, 0)),
        out_shape=jax.ShapeDtypeStruct((num_graphs, out_pad), jnp.float32),
        scratch_shapes=[
            pltpu.VMEM((n_pad, hidden), jnp.float32),          # h (layer input)
            pltpu.VMEM((n_pad, hidden), jnp.float32),          # h_new (layer output)
            pltpu.VMEM((heads * n_pad, hidden), jnp.float32),  # per-head xp, stacked
            pltpu.VMEM((hp, n_pad), jnp.float32),              # a_src^T
            pltpu.VMEM((n_pad, hp), jnp.float32),              # a_dst
        ],
        compiler_params=pltpu.CompilerParams(
            dimension_semantics=("arbitrary", "arbitrary"),
            vmem_limit_bytes=48 * 1024 * 1024),
    )(x_pad, params["lin_w"], params["lin_b"].reshape(1, -1),
      sdst, ssrc, adjb, ealphaT, w_all, asrc_m, adst_m, pp,
      sel, fc1_w, fc1_b, fc2_w, fc2_b)

    return out[:, :out_dim]


# --------------------------------- main ------------------------------------ #

if __name__ == "__main__":
    # hyperparameters implied by the module
    N_PER_GRAPH = 16
    NUM_GRAPHS = 2
    N = N_PER_GRAPH * NUM_GRAPHS
    NODE_F = 8          # node_features
    EDGE_F = 4          # edge_features
    HIDDEN = 32         # hidden_channels
    HEADS = 2           # heads
    CONV_LAYERS = 2     # conv_layer_count
    # conv_layer_dropout = [0, 0]; fc_layer_dropout = [0, 0] -> no Dropout1d layers

    key = jax.random.PRNGKey(0)
    keys = iter(jax.random.split(key, 64))

    def u(shape, scale=0.1):
        return jax.random.uniform(next(keys), shape, jnp.float32, -scale, scale)

    # deterministic within-graph edges (ring + chord); PyG convention: [0]=src, [1]=dst
    src, dst = [], []
    for g in range(NUM_GRAPHS):
        off = g * N_PER_GRAPH
        for i in range(N_PER_GRAPH):
            src += [off + i, off + i]
            dst += [off + (i + 1) % N_PER_GRAPH, off + (i + 5) % N_PER_GRAPH]
    edge_index = jnp.array([src, dst], dtype=jnp.int32)
    E = edge_index.shape[1]

    x = jax.random.normal(next(keys), (N, NODE_F), jnp.float32)
    edge_attr = jax.random.normal(next(keys), (E, EDGE_F), jnp.float32)
    batch = jnp.repeat(jnp.arange(NUM_GRAPHS, dtype=jnp.int32), N_PER_GRAPH)

    params = {
        "lin_w": u((NODE_F, HIDDEN)),
        "lin_b": u((HIDDEN,)),
        "conv": [],
        "fc": [],
    }
    for _ in range(CONV_LAYERS):
        params["conv"].append({
            "bn_w": jnp.ones((HIDDEN,), jnp.float32),     # BatchNorm default init
            "bn_b": jnp.zeros((HIDDEN,), jnp.float32),
            "w_src": u((HEADS, HIDDEN, HIDDEN)),          # shared lin for src/dst
            "att_src": u((HEADS, HIDDEN)),
            "att_dst": u((HEADS, HIDDEN)),
            "w_edge": u((HEADS, EDGE_F, HIDDEN)),
            "att_edge": u((HEADS, HIDDEN)),
            "bias": u((HIDDEN,)),
        })
    # fc_layer_count=2: Linear(HIDDEN, HIDDEN), Linear(HIDDEN, 1)
    for din, dout in [(HIDDEN, HIDDEN), (HIDDEN, 1)]:
        params["fc"].append({"w": u((din, dout)), "b": u((dout,))})

    out = gnn_forward(params, x, edge_index, edge_attr, batch,
                      num_graphs=NUM_GRAPHS, heads=HEADS, dst_tile=16)
    out = jax.block_until_ready(out)
    assert out.shape == (NUM_GRAPHS, 1)
    assert bool(jnp.all(jnp.isfinite(out)))
    print("KERNEL_OK")
</pallas_src>

<mosaic_0001>
module attributes {stable_mosaic.version = 11 : i64} {
  func.func private @main(%arg0: i32) attributes {dimension_semantics = [#tpu.dimension_semantics<core_parallel>], iteration_bounds = array<i64: 2>, tpu.core_type = #tpu.core_type<sc_scalar_subcore>, window_params = []} {
    return
  }
}

module attributes {stable_mosaic.version = 11 : i64} {
  func.func private @main(%arg0: i32) attributes {dimension_semantics = [#tpu.dimension_semantics<core_parallel>], iteration_bounds = array<i64: 2>, tpu.core_type = #tpu.core_type<sc_scalar_subcore>, window_params = []} {
    return
  }
}

module attributes {stable_mosaic.version = 11 : i64} {
  func.func @_gnn_kernel(%arg0: i32, %arg1: i32, %arg2: memref<32x8xf32, #tpu.memory_space<vmem>>, %arg3: memref<8x32xf32, #tpu.memory_space<vmem>>, %arg4: memref<1x32xf32, #tpu.memory_space<vmem>>, %arg5: memref<16x96xbf16, #tpu.memory_space<vmem>>, %arg6: memref<96x32xbf16, #tpu.memory_space<vmem>>, %arg7: memref<16x32xbf16, #tpu.memory_space<vmem>>, %arg8: memref<1x8x96xbf16, #tpu.memory_space<vmem>>, %arg9: memref<1x32x64xf32, #tpu.memory_space<vmem>>, %arg10: memref<1x64x8xf32, #tpu.memory_space<vmem>>, %arg11: memref<1x64x8xf32, #tpu.memory_space<vmem>>, %arg12: memref<1x8x32xf32, #tpu.memory_space<vmem>>, %arg13: memref<2x32xf32, #tpu.memory_space<vmem>>, %arg14: memref<32x32xf32, #tpu.memory_space<vmem>>, %arg15: memref<1x32xf32, #tpu.memory_space<vmem>>, %arg16: memref<32x128xf32, #tpu.memory_space<vmem>>, %arg17: memref<1x128xf32, #tpu.memory_space<vmem>>, %arg18: memref<2x128xf32, #tpu.memory_space<vmem>>, %arg19: memref<32x32xf32, #tpu.memory_space<vmem>>, %arg20: memref<32x32xf32, #tpu.memory_space<vmem>>, %arg21: memref<64x32xf32, #tpu.memory_space<vmem>>, %arg22: memref<8x32xf32, #tpu.memory_space<vmem>>, %arg23: memref<32x8xf32, #tpu.memory_space<vmem>>) attributes {dimension_semantics = [#tpu.dimension_semantics<arbitrary>, #tpu.dimension_semantics<arbitrary>], iteration_bounds = array<i64: 2, 2>, scalar_prefetch = 0 : i64, scratch_operands = 5 : i64, tpu.core_type = #tpu.core_type<tc>, window_params = [{pipeline_mode = #tpu.pipeline_mode<synchronous>, transform_indices = @transform_0, window_bounds = array<i64: 32, 8>}, {pipeline_mode = #tpu.pipeline_mode<synchronous>, transform_indices = @transform_1, window_bounds = array<i64: 8, 32>}, {pipeline_mode = #tpu.pipeline_mode<synchronous>, transform_indices = @transform_2, window_bounds = array<i64: 1, 32>}, {transform_indices = @transform_3, window_bounds = array<i64: 16, 96>}, {pipeline_mode = #tpu.pipeline_mode<synchronous>, transform_indices = @transform_4, window_bounds = array<i64: 96, 32>}, {transform_indices = @transform_5, window_bounds = array<i64: 16, 32>}, {transform_indices = @transform_6, window_bounds = array<i64: 1, 8, 96>}, {transform_indices = @transform_7, window_bounds = array<i64: 1, 32, 64>}, {transform_indices = @transform_8, window_bounds = array<i64: 1, 64, 8>}, {transform_indices = @transform_9, window_bounds = array<i64: 1, 64, 8>}, {transform_indices = @transform_10, window_bounds = array<i64: 1, 8, 32>}, {pipeline_mode = #tpu.pipeline_mode<synchronous>, transform_indices = @transform_11, window_bounds = array<i64: 2, 32>}, {pipeline_mode = #tpu.pipeline_mode<synchronous>, transform_indices = @transform_12, window_bounds = array<i64: 32, 32>}, {pipeline_mode = #tpu.pipeline_mode<synchronous>, transform_indices = @transform_13, window_bounds = array<i64: 1, 32>}, {pipeline_mode = #tpu.pipeline_mode<synchronous>, transform_indices = @transform_14, window_bounds = array<i64: 32, 128>}, {pipeline_mode = #tpu.pipeline_mode<synchronous>, transform_indices = @transform_15, window_bounds = array<i64: 1, 128>}, {pipeline_mode = #tpu.pipeline_mode<synchronous>, transform_indices = @transform_16, window_bounds = array<i64: 2, 128>}]} {
    %c0_i32 = arith.constant 0 : i32
    %0 = arith.cmpi eq, %arg0, %c0_i32 : i32
    %c0_i32_0 = arith.constant 0 : i32
    %1 = arith.cmpi eq, %arg1, %c0_i32_0 : i32
    %2 = arith.andi %0, %1 : i1
    %3 = arith.extui %2 : i1 to i32
    %c0_i32_1 = arith.constant 0 : i32
    %4 = arith.cmpi ne, %3, %c0_i32_1 : i32
    scf.if %4 {
      %c0_42 = arith.constant 0 : index
      %c0_43 = arith.constant 0 : index
      %109 = vector.load %arg2[%c0_42, %c0_43] : memref<32x8xf32, #tpu.memory_space<vmem>>, vector<32x8xf32>
      %c0_44 = arith.constant 0 : index
      %c0_45 = arith.constant 0 : index
      %110 = vector.load %arg3[%c0_44, %c0_45] : memref<8x32xf32, #tpu.memory_space<vmem>>, vector<8x32xf32>
      %cst_46 = arith.constant dense<0.000000e+00> : vector<32x32xf32>
      %111 = tpu.matmul %109, %110, %cst_46 {dimension_numbers = #tpu.dot_dimension_numbers<[1], [0], [0], [1], [0, 0, 1, 1], [], []>} : vector<32x8xf32>, vector<8x32xf32>, vector<32x32xf32> -> vector<32x32xf32>
      %c0_47 = arith.constant 0 : index
      %c0_48 = arith.constant 0 : index
      %112 = vector.load %arg4[%c0_47, %c0_48] : memref<1x32xf32, #tpu.memory_space<vmem>>, vector<1x32xf32>
      %113 = vector.broadcast %112 : vector<1x32xf32> to vector<32x32xf32>
      %114 = arith.addf %111, %113 : vector<32x32xf32>
      %cst_49 = arith.constant 0.000000e+00 : f32
      %115 = vector.broadcast %cst_49 : f32 to vector<32x32xf32>
      %116 = arith.maximumf %114, %115 : vector<32x32xf32>
      %117 = tpu.iota {dimensions = array<i32: 0>} : vector<32x1xi32>
      %c32_i32_50 = arith.constant 32 : i32
      %118 = vector.broadcast %c32_i32_50 : i32 to vector<32x1xi32>
      %119 = arith.cmpi slt, %117, %118 : vector<32x1xi32>
      %cst_51 = arith.constant 0.000000e+00 : f32
      %120 = vector.shape_cast %119 : vector<32x1xi1> to vector<32x1xi1>
      %121 = vector.broadcast %120 : vector<32x1xi1> to vector<32x32xi1>
      %122 = vector.broadcast %cst_51 : f32 to vector<32x32xf32>
      %123 = arith.select %121, %116, %122 : vector<32x32xi1>, vector<32x32xf32>
      %c0_52 = arith.constant 0 : index
      %c0_53 = arith.constant 0 : index
      %124 = vector.load %arg19[%c0_52, %c0_53] : memref<32x32xf32, #tpu.memory_space<vmem>>, vector<32x32xf32>
      tpu.vector_store %arg19[%c0_52, %c0_53], %123 {strides = array<i32>} : memref<32x32xf32, #tpu.memory_space<vmem>>, vector<32x32xf32>,
    } else {
    }
    %c0_i32_2 = arith.constant 0 : i32
    %5 = arith.cmpi eq, %arg1, %c0_i32_2 : i32
    %6 = arith.extui %5 : i1 to i32
    %c0_i32_3 = arith.constant 0 : i32
    %7 = arith.cmpi ne, %6, %c0_i32_3 : i32
    scf.if %7 {
      %c0_42 = arith.constant 0 : index
      %c0_43 = arith.constant 0 : index
      %109 = vector.load %arg19[%c0_42, %c0_43] : memref<32x32xf32, #tpu.memory_space<vmem>>, vector<32x32xf32>
      %cst_44 = arith.constant dense<0.000000e+00> : vector<32xf32>
      %110 = vector.multi_reduction <add>, %109, %cst_44 [0] : vector<32x32xf32> to vector<32xf32>
      %111 = vector.shape_cast %110 : vector<32xf32> to vector<1x32xf32>
      %cst_45 = arith.constant 3.125000e-02 : f32
      %112 = vector.broadcast %cst_45 : f32 to vector<1x32xf32>
      %113 = arith.mulf %111, %112 : vector<1x32xf32>
      %114 = vector.broadcast %113 : vector<1x32xf32> to vector<32x32xf32>
      %115 = arith.subf %109, %114 : vector<32x32xf32>
      %116 = arith.mulf %115, %115 : vector<32x32xf32>
      %cst_46 = arith.constant dense<0.000000e+00> : vector<32xf32>
      %117 = vector.multi_reduction <add>, %116, %cst_46 [0] : vector<32x32xf32> to vector<32xf32>
      %118 = vector.shape_cast %117 : vector<32xf32> to vector<1x32xf32>
      %cst_47 = arith.constant 0.000000e+00 : f32
      %119 = vector.broadcast %cst_47 : f32 to vector<1x32xf32>
      %120 = arith.mulf %119, %113 : vector<1x32xf32>
      %121 = arith.mulf %120, %113 : vector<1x32xf32>
      %122 = arith.subf %118, %121 : vector<1x32xf32>
      %cst_48 = arith.constant 3.125000e-02 : f32
      %123 = vector.broadcast %cst_48 : f32 to vector<1x32xf32>
      %124 = arith.mulf %122, %123 : vector<1x32xf32>
      %c0_49 = arith.constant 0 : index
      %c0_50 = arith.constant 0 : index
      %c0_51 = arith.constant 0 : index
      %125 = vector.load %arg12[%c0_49, %c0_50, %c0_51] : memref<1x8x32xf32, #tpu.memory_space<vmem>>, vector<1x8x32xf32>
      %126 = vector.shape_cast %125 : vector<1x8x32xf32> to vector<8x32xf32>
      %127 = vector.broadcast %113 : vector<1x32xf32> to vector<32x32xf32>
      %128 = arith.subf %109, %127 : vector<32x32xf32>
      %cst_52 = arith.constant 9.99999974E-6 : f32
      %129 = vector.broadcast %cst_52 : f32 to vector<1x32xf32>
      %130 = arith.addf %124, %129 : vector<1x32xf32>
      %131 = math.rsqrt %130 : vector<1x32xf32>
      %132 = vector.broadcast %131 : vector<1x32xf32> to vector<32x32xf32>
      %133 = arith.mulf %128, %132 : vector<32x32xf32>
      %134 = vector.extract_strided_slice %126 {offsets = [0, 0], sizes = [1, 32], strides = [1, 1]} : vector<8x32xf32> to vector<1x32xf32>
      %135 = vector.broadcast %134 : vector<1x32xf32> to vector<32x32xf32>
      %136 = arith.mulf %133, %135 : vector<32x32xf32>
      %137 = vector.extract_strided_slice %126 {offsets = [1, 0], sizes = [1, 32], strides = [1, 1]} : vector<8x32xf32> to vector<1x32xf32>
      %138 = vector.broadcast %137 : vector<1x32xf32> to vector<32x32xf32>
      %139 = arith.addf %136, %138 : vector<32x32xf32>
      %c0_53 = arith.constant 0 : index
      %c0_54 = arith.constant 0 : index
      %c0_55 = arith.constant 0 : index
      %140 = vector.load %arg9[%c0_53, %c0_54, %c0_55] : memref<1x32x64xf32, #tpu.memory_space<vmem>>, vector<1x32x64xf32>
      %141 = vector.shape_cast %140 : vector<1x32x64xf32> to vector<32x64xf32>
      %cst_56 = arith.constant dense<0.000000e+00> : vector<32x64xf32>
      %142 = tpu.matmul %139, %141, %cst_56 {dimension_numbers = #tpu.dot_dimension_numbers<[1], [0], [0], [1], [0, 0, 1, 1], [], []>} : vector<32x32xf32>, vector<32x64xf32>, vector<32x64xf32> -> vector<32x64xf32>
      %143 = vector.extract_strided_slice %142 {offsets = [0, 0], sizes = [32, 32], strides = [1, 1]} : vector<32x64xf32> to vector<32x32xf32>
      %144 = vector.extract_strided_slice %142 {offsets = [0, 32], sizes = [32, 32], strides = [1, 1]} : vector<32x64xf32> to vector<32x32xf32>
      %145 = tpu.concatenate %143, %144 in 0 : vector<32x32xf32>, vector<32x32xf32> -> vector<64x32xf32>
      %c0_57 = arith.constant 0 : index
      %c0_58 = arith.constant 0 : index
      %146 = vector.load %arg21[%c0_57, %c0_58] : memref<64x32xf32, #tpu.memory_space<vmem>>, vector<64x32xf32>
      tpu.vector_store %arg21[%c0_57, %c0_58], %145 {strides = array<i32>} : memref<64x32xf32, #tpu.memory_space<vmem>>, vector<64x32xf32>,
      %c0_59 = arith.constant 0 : index
      %c0_60 = arith.constant 0 : index
      %c0_61 = arith.constant 0 : index
      %147 = vector.load %arg10[%c0_59, %c0_60, %c0_61] : memref<1x64x8xf32, #tpu.memory_space<vmem>>, vector<1x64x8xf32>
      %148 = vector.shape_cast %147 : vector<1x64x8xf32> to vector<64x8xf32>
      %cst_62 = arith.constant dense<0.000000e+00> : vector<32x8xf32>
      %149 = tpu.matmul %142, %148, %cst_62 {dimension_numbers = #tpu.dot_dimension_numbers<[1], [0], [0], [1], [0, 0, 1, 1], [], []>} : vector<32x64xf32>, vector<64x8xf32>, vector<32x8xf32> -> vector<32x8xf32>
      %150 = tpu.transpose %149, [1, 0] : vector<32x8xf32> -> vector<8x32xf32>
      %c0_63 = arith.constant 0 : index
      %c0_64 = arith.constant 0 : index
      %151 = vector.load %arg22[%c0_63, %c0_64] : memref<8x32xf32, #tpu.memory_space<vmem>>, vector<8x32xf32>
      tpu.vector_store %arg22[%c0_63, %c0_64], %150 {strides = array<i32>} : memref<8x32xf32, #tpu.memory_space<vmem>>, vector<8x32xf32>,
      %c0_65 = arith.constant 0 : index
      %c0_66 = arith.constant 0 : index
      %c0_67 = arith.constant 0 : index
      %152 = vector.load %arg11[%c0_65, %c0_66, %c0_67] : memref<1x64x8xf32, #tpu.memory_space<vmem>>, vector<1x64x8xf32>
      %153 = vector.shape_cast %152 : vector<1x64x8xf32> to vector<64x8xf32>
      %cst_68 = arith.constant dense<0.000000e+00> : vector<32x8xf32>
      %154 = tpu.matmul %142, %153, %cst_68 {dimension_numbers = #tpu.dot_dimension_numbers<[1], [0], [0], [1], [0, 0, 1, 1], [], []>} : vector<32x64xf32>, vector<64x8xf32>, vector<32x8xf32> -> vector<32x8xf32>
      %c0_69 = arith.constant 0 : index
      %c0_70 = arith.constant 0 : index
      %155 = vector.load %arg23[%c0_69, %c0_70] : memref<32x8xf32, #tpu.memory_space<vmem>>, vector<32x8xf32>
      tpu.vector_store %arg23[%c0_69, %c0_70], %154 {strides = array<i32>} : memref<32x8xf32, #tpu.memory_space<vmem>>, vector<32x8xf32>,
    } else {
    }
    %c0 = arith.constant 0 : index
    %c0_4 = arith.constant 0 : index
    %8 = vector.load %arg5[%c0, %c0_4] : memref<16x96xbf16, #tpu.memory_space<vmem>>, vector<16x96xbf16>
    %c0_5 = arith.constant 0 : index
    %c0_6 = arith.constant 0 : index
    %c0_7 = arith.constant 0 : index
    %9 = vector.load %arg8[%c0_5, %c0_6, %c0_7] : memref<1x8x96xbf16, #tpu.memory_space<vmem>>, vector<1x8x96xbf16>
    %10 = vector.shape_cast %9 : vector<1x8x96xbf16> to vector<8x96xbf16>
    %11 = vector.extract_strided_slice %10 {offsets = [0, 0], sizes = [1, 96], strides = [1, 1]} : vector<8x96xbf16> to vector<1x96xbf16>
    %12 = vector.broadcast %11 : vector<1x96xbf16> to vector<16x96xbf16>
    %13 = arith.mulf %8, %12 : vector<16x96xbf16>
    %14 = vector.extract_strided_slice %10 {offsets = [1, 0], sizes = [1, 96], strides = [1, 1]} : vector<8x96xbf16> to vector<1x96xbf16>
    %15 = vector.broadcast %14 : vector<1x96xbf16> to vector<16x96xbf16>
    %16 = arith.mulf %8, %15 : vector<16x96xbf16>
    %17 = tpu.concatenate %13, %16 in 0 : vector<16x96xbf16>, vector<16x96xbf16> -> vector<32x96xbf16>
    %c0_8 = arith.constant 0 : index
    %c0_9 = arith.constant 0 : index
    %18 = vector.load %arg6[%c0_8, %c0_9] : memref<96x32xbf16, #tpu.memory_space<vmem>>, vector<96x32xbf16>
    %cst = arith.constant dense<0.000000e+00> : vector<32x32xf32>
    %19 = tpu.matmul %17, %18, %cst {dimension_numbers = #tpu.dot_dimension_numbers<[1], [0], [0], [1], [0, 0, 1, 1], [], []>} : vector<32x96xbf16>, vector<96x32xbf16>, vector<32x32xf32> -> vector<32x32xf32>
    %c16_i32 = arith.constant 16 : i32
    %20 = arith.muli %arg1, %c16_i32 : i32
    %21 = tpu.assume_multiple %20, 16 : i32
    %22 = arith.index_cast %21 : i32 to index
    %c0_10 = arith.constant 0 : index
    %23 = vector.load %arg23[%22, %c0_10] : memref<32x8xf32, #tpu.memory_space<vmem>>, vector<16x8xf32>
    %c0_11 = arith.constant 0 : index
    %c0_12 = arith.constant 0 : index
    %24 = vector.load %arg7[%c0_11, %c0_12] : memref<16x32xbf16, #tpu.memory_space<vmem>>, vector<16x32xbf16>
    %25 = arith.extf %24 : vector<16x32xbf16> to vector<16x32xf32>
    %c0_13 = arith.constant 0 : index
    %c0_14 = arith.constant 0 : index
    %c0_15 = arith.constant 0 : index
    %26 = vector.load %arg12[%c0_13, %c0_14, %c0_15] : memref<1x8x32xf32, #tpu.memory_space<vmem>>, vector<1x8x32xf32>
    %27 = vector.shape_cast %26 : vector<1x8x32xf32> to vector<8x32xf32>
    %28 = vector.extract_strided_slice %27 {offsets = [2, 0], sizes = [1, 32], strides = [1, 1]} : vector<8x32xf32> to vector<1x32xf32>
    %cst_16 = arith.constant 0.000000e+00 : f32
    %29 = vector.broadcast %cst_16 : f32 to vector<16x32xf32>
    %30 = vector.extract_strided_slice %23 {offsets = [0, 0], sizes = [16, 1], strides = [1, 1]} : vector<16x8xf32> to vector<16x1xf32>
    %c0_17 = arith.constant 0 : index
    %c0_18 = arith.constant 0 : index
    %31 = vector.load %arg22[%c0_17, %c0_18] : memref<8x32xf32, #tpu.memory_space<vmem>>, vector<1x32xf32>
    %32 = vector.broadcast %30 : vector<16x1xf32> to vector<16x32xf32>
    %33 = vector.broadcast %31 : vector<1x32xf32> to vector<16x32xf32>
    %34 = arith.addf %32, %33 : vector<16x32xf32>
    %35 = vector.extract_strided_slice %19 {offsets = [0, 0], sizes = [16, 32], strides = [1, 1]} : vector<32x32xf32> to vector<16x32xf32>
    %36 = arith.addf %34, %35 : vector<16x32xf32>
    %cst_19 = arith.constant 0.000000e+00 : f32
    %37 = vector.broadcast %cst_19 : f32 to vector<16x32xf32>
    %38 = arith.cmpf oge, %36, %37 : vector<16x32xf32>
    %cst_20 = arith.constant 2.000000e-01 : f32
    %39 = vector.broadcast %cst_20 : f32 to vector<16x32xf32>
    %40 = arith.mulf %39, %36 : vector<16x32xf32>
    %41 = arith.select %38, %36, %40 : vector<16x32xi1>, vector<16x32xf32>
    %42 = arith.addf %41, %25 : vector<16x32xf32>
    %cst_21 = arith.constant dense<0xFF800000> : vector<16xf32>
    %43 = vector.multi_reduction <maximumf>, %42, %cst_21 [1] : vector<16x32xf32> to vector<16xf32>
    %44 = vector.shape_cast %43 : vector<16xf32> to vector<16x1xf32>
    %45 = vector.broadcast %44 : vector<16x1xf32> to vector<16x32xf32>
    %46 = arith.subf %42, %45 : vector<16x32xf32>
    %47 = math.exp %46 : vector<16x32xf32>
    %cst_22 = arith.constant dense<0.000000e+00> : vector<16xf32>
    %48 = vector.multi_reduction <add>, %47, %cst_22 [1] : vector<16x32xf32> to vector<16xf32>
    %49 = vector.shape_cast %48 : vector<16xf32> to vector<16x1xf32>
    %c0_23 = arith.constant 0 : index
    %c0_24 = arith.constant 0 : index
    %50 = vector.load %arg21[%c0_23, %c0_24] : memref<64x32xf32, #tpu.memory_space<vmem>>, vector<32x32xf32>
    %cst_25 = arith.constant dense<0.000000e+00> : vector<16x32xf32>
    %51 = tpu.matmul %47, %50, %cst_25 {dimension_numbers = #tpu.dot_dimension_numbers<[1], [0], [0], [1], [0, 0, 1, 1], [], []>} : vector<16x32xf32>, vector<32x32xf32>, vector<16x32xf32> -> vector<16x32xf32>
    %52 = tpu.reciprocal %49 : vector<16x1xf32> -> vector<16x1xf32>
    %53 = vector.broadcast %52 : vector<16x1xf32> to vector<16x32xf32>
    %54 = arith.mulf %51, %53 : vector<16x32xf32>
    %55 = arith.addf %29, %54 : vector<16x32xf32>
    %56 = vector.extract_strided_slice %23 {offsets = [0, 1], sizes = [16, 1], strides = [1, 1]} : vector<16x8xf32> to vector<16x1xf32>
    %c1 = arith.constant 1 : index
    %c0_26 = arith.constant 0 : index
    %57 = vector.load %arg22[%c1, %c0_26] : memref<8x32xf32, #tpu.memory_space<vmem>>, vector<1x32xf32>
    %58 = vector.broadcast %56 : vector<16x1xf32> to vector<16x32xf32>
    %59 = vector.broadcast %57 : vector<1x32xf32> to vector<16x32xf32>
    %60 = arith.addf %58, %59 : vector<16x32xf32>
    %61 = vector.extract_strided_slice %19 {offsets = [16, 0], sizes = [16, 32], strides = [1, 1]} : vector<32x32xf32> to vector<16x32xf32>
    %62 = arith.addf %60, %61 : vector<16x32xf32>
    %cst_27 = arith.constant 0.000000e+00 : f32
    %63 = vector.broadcast %cst_27 : f32 to vector<16x32xf32>
    %64 = arith.cmpf oge, %62, %63 : vector<16x32xf32>
    %cst_28 = arith.constant 2.000000e-01 : f32
    %65 = vector.broadcast %cst_28 : f32 to vector<16x32xf32>
    %66 = arith.mulf %65, %62 : vector<16x32xf32>
    %67 = arith.select %64, %62, %66 : vector<16x32xi1>, vector<16x32xf32>
    %68 = arith.addf %67, %25 : vector<16x32xf32>
    %cst_29 = arith.constant dense<0xFF800000> : vector<16xf32>
    %69 = vector.multi_reduction <maximumf>, %68, %cst_29 [1] : vector<16x32xf32> to vector<16xf32>
    %70 = vector.shape_cast %69 : vector<16xf32> to vector<16x1xf32>
    %71 = vector.broadcast %70 : vector<16x1xf32> to vector<16x32xf32>
    %72 = arith.subf %68, %71 : vector<16x32xf32>
    %73 = math.exp %72 : vector<16x32xf32>
    %cst_30 = arith.constant dense<0.000000e+00> : vector<16xf32>
    %74 = vector.multi_reduction <add>, %73, %cst_30 [1] : vector<16x32xf32> to vector<16xf32>
    %75 = vector.shape_cast %74 : vector<16xf32> to vector<16x1xf32>
    %c32 = arith.constant 32 : index
    %c0_31 = arith.constant 0 : index
    %76 = vector.load %arg21[%c32, %c0_31] : memref<64x32xf32, #tpu.memory_space<vmem>>, vector<32x32xf32>
    %cst_32 = arith.constant dense<0.000000e+00> : vector<16x32xf32>
    %77 = tpu.matmul %73, %76, %cst_32 {dimension_numbers = #tpu.dot_dimension_numbers<[1], [0], [0], [1], [0, 0, 1, 1], [], []>} : vector<16x32xf32>, vector<32x32xf32>, vector<16x32xf32> -> vector<16x32xf32>
    %78 = tpu.reciprocal %75 : vector<16x1xf32> -> vector<16x1xf32>
    %79 = vector.broadcast %78 : vector<16x1xf32> to vector<16x32xf32>
    %80 = arith.mulf %77, %79 : vector<16x32xf32>
    %81 = arith.addf %55, %80 : vector<16x32xf32>
    %82 = tpu.iota {dimensions = array<i32: 0>} : vector<16x1xi32>
    %83 = vector.broadcast %21 : i32 to vector<16x1xi32>
    %84 = arith.addi %82, %83 : vector<16x1xi32>
    %cst_33 = arith.constant 5.000000e-01 : f32
    %85 = vector.broadcast %cst_33 : f32 to vector<16x32xf32>
    %86 = arith.mulf %81, %85 : vector<16x32xf32>
    %87 = vector.broadcast %28 : vector<1x32xf32> to vector<16x32xf32>
    %88 = arith.addf %86, %87 : vector<16x32xf32>
    %cst_34 = arith.constant 0.000000e+00 : f32
    %89 = vector.broadcast %cst_34 : f32 to vector<16x32xf32>
    %90 = arith.maximumf %88, %89 : vector<16x32xf32>
    %c32_i32 = arith.constant 32 : i32
    %91 = vector.broadcast %c32_i32 : i32 to vector<16x1xi32>
    %92 = arith.cmpi slt, %84, %91 : vector<16x1xi32>
    %cst_35 = arith.constant 0.000000e+00 : f32
    %93 = vector.shape_cast %92 : vector<16x1xi1> to vector<16x1xi1>
    %94 = vector.broadcast %93 : vector<16x1xi1> to vector<16x32xi1>
    %95 = vector.broadcast %cst_35 : f32 to vector<16x32xf32>
    %96 = arith.select %94, %90, %95 : vector<16x32xi1>, vector<16x32xf32>
    %97 = arith.index_cast %21 : i32 to index
    %c0_36 = arith.constant 0 : index
    %98 = vector.load %arg20[%97, %c0_36] : memref<32x32xf32, #tpu.memory_space<vmem>>, vector<16x32xf32>
    tpu.vector_store %arg20[%97, %c0_36], %96 {strides = array<i32>} : memref<32x32xf32, #tpu.memory_space<vmem>>, vector<16x32xf32>,
    %c1_i32 = arith.constant 1 : i32
    %99 = arith.cmpi eq, %arg1, %c1_i32 : i32
    %c1_i32_37 = arith.constant 1 : i32
    %100 = arith.cmpi slt, %arg0, %c1_i32_37 : i32
    %101 = arith.andi %99, %100 : i1
    %102 = arith.extui %101 : i1 to i32
    %c0_i32_38 = arith.constant 0 : i32
    %103 = arith.cmpi ne, %102, %c0_i32_38 : i32
    scf.if %103 {
      %c0_42 = arith.constant 0 : index
      %c0_43 = arith.constant 0 : index
      %109 = vector.load %arg20[%c0_42, %c0_43] : memref<32x32xf32, #tpu.memory_space<vmem>>, vector<32x32xf32>
      %c0_44 = arith.constant 0 : index
      %c0_45 = arith.constant 0 : index
      %110 = vector.load %arg19[%c0_44, %c0_45] : memref<32x32xf32, #tpu.memory_space<vmem>>, vector<32x32xf32>
      tpu.vector_store %arg19[%c0_44, %c0_45], %109 {strides = array<i32>} : memref<32x32xf32, #tpu.memory_space<vmem>>, vector<32x32xf32>,
    } else {
    }
    %c1_i32_39 = arith.constant 1 : i32
    %104 = arith.cmpi eq, %arg1, %c1_i32_39 : i32
    %c1_i32_40 = arith.constant 1 : i32
    %105 = arith.cmpi eq, %arg0, %c1_i32_40 : i32
    %106 = arith.andi %104, %105 : i1
    %107 = arith.extui %106 : i1 to i32
    %c0_i32_41 = arith.constant 0 : i32
    %108 = arith.cmpi ne, %107, %c0_i32_41 : i32
    scf.if %108 {
      %c0_42 = arith.constant 0 : index
      %c0_43 = arith.constant 0 : index
      %109 = vector.load %arg13[%c0_42, %c0_43] : memref<2x32xf32, #tpu.memory_space<vmem>>, vector<2x32xf32>
      %c0_44 = arith.constant 0 : index
      %c0_45 = arith.constant 0 : index
      %110 = vector.load %arg20[%c0_44, %c0_45] : memref<32x32xf32, #tpu.memory_space<vmem>>, vector<32x32xf32>
      %cst_46 = arith.constant dense<0.000000e+00> : vector<2x32xf32>
      %111 = tpu.matmul %109, %110, %cst_46 {dimension_numbers = #tpu.dot_dimension_numbers<[1], [0], [0], [1], [0, 0, 1, 1], [], []>} : vector<2x32xf32>, vector<32x32xf32>, vector<2x32xf32> -> vector<2x32xf32>
      %c0_47 = arith.constant 0 : index
      %c0_48 = arith.constant 0 : index
      %112 = vector.load %arg14[%c0_47, %c0_48] : memref<32x32xf32, #tpu.memory_space<vmem>>, vector<32x32xf32>
      %cst_49 = arith.constant dense<0.000000e+00> : vector<2x32xf32>
      %113 = tpu.matmul %111, %112, %cst_49 {dimension_numbers = #tpu.dot_dimension_numbers<[1], [0], [0], [1], [0, 0, 1, 1], [], []>} : vector<2x32xf32>, vector<32x32xf32>, vector<2x32xf32> -> vector<2x32xf32>
      %c0_50 = arith.constant 0 : index
      %c0_51 = arith.constant 0 : index
      %114 = vector.load %arg15[%c0_50, %c0_51] : memref<1x32xf32, #tpu.memory_space<vmem>>, vector<1x32xf32>
      %115 = vector.broadcast %114 : vector<1x32xf32> to vector<2x32xf32>
      %116 = arith.addf %113, %115 : vector<2x32xf32>
      %cst_52 = arith.constant 0.000000e+00 : f32
      %117 = vector.broadcast %cst_52 : f32 to vector<2x32xf32>
      %118 = arith.maximumf %116, %117 : vector<2x32xf32>
      %c0_53 = arith.constant 0 : index
      %c0_54 = arith.constant 0 : index
      %119 = vector.load %arg16[%c0_53, %c0_54] : memref<32x128xf32, #tpu.memory_space<vmem>>, vector<32x128xf32>
      %cst_55 = arith.constant dense<0.000000e+00> : vector<2x128xf32>
      %120 = tpu.matmul %118, %119, %cst_55 {dimension_numbers = #tpu.dot_dimension_numbers<[1], [0], [0], [1], [0, 0, 1, 1], [], []>} : vector<2x32xf32>, vector<32x128xf32>, vector<2x128xf32> -> vector<2x128xf32>
      %c0_56 = arith.constant 0 : index
      %c0_57 = arith.constant 0 : index
      %121 = vector.load %arg17[%c0_56, %c0_57] : memref<1x128xf32, #tpu.memory_space<vmem>>, vector<1x128xf32>
      %122 = vector.broadcast %121 : vector<1x128xf32> to vector<2x128xf32>
      %123 = arith.addf %120, %122 : vector<2x128xf32>
      %cst_58 = arith.constant 0.000000e+00 : f32
      %124 = vector.broadcast %cst_58 : f32 to vector<2x128xf32>
      %125 = arith.maximumf %123, %124 : vector<2x128xf32>
      %c0_59 = arith.constant 0 : index
      %c0_60 = arith.constant 0 : index
      %126 = vector.load %arg18[%c0_59, %c0_60] : memref<2x128xf32, #tpu.memory_space<vmem>>, vector<2x128xf32>
      tpu.vector_store %arg18[%c0_59, %c0_60], %125 {strides = array<i32>} : memref<2x128xf32, #tpu.memory_space<vmem>>, vector<2x128xf32>,
    } else {
    }
    return
  }
  func.func @transform_0(%arg0: i32, %arg1: i32) -> (i32, i32) {
    %c0_i32 = arith.constant 0 : i32
    %c0_i32_0 = arith.constant 0 : i32
    %c0_i32_1 = arith.constant 0 : i32
    return %c0_i32, %c0_i32_0 : i32, i32
  }
  func.func @transform_1(%arg0: i32, %arg1: i32) -> (i32, i32) {
    %c0_i32 = arith.constant 0 : i32
    %c0_i32_0 = arith.constant 0 : i32
    %c0_i32_1 = arith.constant 0 : i32
    return %c0_i32, %c0_i32_0 : i32, i32
  }
  func.func @transform_2(%arg0: i32, %arg1: i32) -> (i32, i32) {
    %c0_i32 = arith.constant 0 : i32
    %c0_i32_0 = arith.constant 0 : i32
    %c0_i32_1 = arith.constant 0 : i32
    return %c0_i32, %c0_i32_0 : i32, i32
  }
  func.func @transform_3(%arg0: i32, %arg1: i32) -> (i32, i32) {
    %c0_i32 = arith.constant 0 : i32
    %c0_i32_0 = arith.constant 0 : i32
    return %arg1, %c0_i32 : i32, i32
  }
  func.func @transform_4(%arg0: i32, %arg1: i32) -> (i32, i32) {
    %c0_i32 = arith.constant 0 : i32
    %c0_i32_0 = arith.constant 0 : i32
    %c0_i32_1 = arith.constant 0 : i32
    return %c0_i32, %c0_i32_0 : i32, i32
  }
  func.func @transform_5(%arg0: i32, %arg1: i32) -> (i32, i32) {
    %c0_i32 = arith.constant 0 : i32
    %c0_i32_0 = arith.constant 0 : i32
    return %arg1, %c0_i32 : i32, i32
  }
  func.func @transform_6(%arg0: i32, %arg1: i32) -> (i32, i32, i32) {
    %c0_i32 = arith.constant 0 : i32
    %c0_i32_0 = arith.constant 0 : i32
    %c0_i32_1 = arith.constant 0 : i32
    return %arg0, %c0_i32, %c0_i32_0 : i32, i32, i32
  }
  func.func @transform_7(%arg0: i32, %arg1: i32) -> (i32, i32, i32) {
    %c0_i32 = arith.constant 0 : i32
    %c0_i32_0 = arith.constant 0 : i32
    %c0_i32_1 = arith.constant 0 : i32
    return %arg0, %c0_i32, %c0_i32_0 : i32, i32, i32
  }
  func.func @transform_8(%arg0: i32, %arg1: i32) -> (i32, i32, i32) {
    %c0_i32 = arith.constant 0 : i32
    %c0_i32_0 = arith.constant 0 : i32
    %c0_i32_1 = arith.constant 0 : i32
    return %arg0, %c0_i32, %c0_i32_0 : i32, i32, i32
  }
  func.func @transform_9(%arg0: i32, %arg1: i32) -> (i32, i32, i32) {
    %c0_i32 = arith.constant 0 : i32
    %c0_i32_0 = arith.constant 0 : i32
    %c0_i32_1 = arith.constant 0 : i32
    return %arg0, %c0_i32, %c0_i32_0 : i32, i32, i32
  }
  func.func @transform_10(%arg0: i32, %arg1: i32) -> (i32, i32, i32) {
    %c0_i32 = arith.constant 0 : i32
    %c0_i32_0 = arith.constant 0 : i32
    %c0_i32_1 = arith.constant 0 : i32
    return %arg0, %c0_i32, %c0_i32_0 : i32, i32, i32
  }
  func.func @transform_11(%arg0: i32, %arg1: i32) -> (i32, i32) {
    %c0_i32 = arith.constant 0 : i32
    %c0_i32_0 = arith.constant 0 : i32
    %c0_i32_1 = arith.constant 0 : i32
    return %c0_i32, %c0_i32_0 : i32, i32
  }
  func.func @transform_12(%arg0: i32, %arg1: i32) -> (i32, i32) {
    %c0_i32 = arith.constant 0 : i32
    %c0_i32_0 = arith.constant 0 : i32
    %c0_i32_1 = arith.constant 0 : i32
    return %c0_i32, %c0_i32_0 : i32, i32
  }
  func.func @transform_13(%arg0: i32, %arg1: i32) -> (i32, i32) {
    %c0_i32 = arith.constant 0 : i32
    %c0_i32_0 = arith.constant 0 : i32
    %c0_i32_1 = arith.constant 0 : i32
    return %c0_i32, %c0_i32_0 : i32, i32
  }
  func.func @transform_14(%arg0: i32, %arg1: i32) -> (i32, i32) {
    %c0_i32 = arith.constant 0 : i32
    %c0_i32_0 = arith.constant 0 : i32
    %c0_i32_1 = arith.constant 0 : i32
    return %c0_i32, %c0_i32_0 : i32, i32
  }
  func.func @transform_15(%arg0: i32, %arg1: i32) -> (i32, i32) {
    %c0_i32 = arith.constant 0 : i32
    %c0_i32_0 = arith.constant 0 : i32
    %c0_i32_1 = arith.constant 0 : i32
    return %c0_i32, %c0_i32_0 : i32, i32
  }
  func.func @transform_16(%arg0: i32, %arg1: i32) -> (i32, i32) {
    %c0_i32 = arith.constant 0 : i32
    %c0_i32_0 = arith.constant 0 : i32
    %c0_i32_1 = arith.constant 0 : i32
    return %c0_i32, %c0_i32_0 : i32, i32
  }
}

</mosaic_0001>

<bundles_post_ra>
// kernel: gnn_forward.1
= control target key start
LH: loop header
LB: loop body
LE: loop exit
PB: predicated region body
PF: predicated region fallthrough
CT: control target
= control target key end

     0   :  { %s2526_s21 = smov 0   ;;  %s2528_s22 = smov 0   ;;  %s2801_s0 = inlined_call_operand.vmem [shape: f32[32,8], index: 0, kind: input, shape index: {}]   ;;  %s2802_s1 = inlined_call_operand.vmem [shape: f32[8,32], index: 1, kind: input, shape index: {}]   ;;  %s2803_s2 = inlined_call_operand.vmem [shape: f32[1,32], index: 2, kind: input, shape index: {}]   ;;  %s2804_s3 = inlined_call_operand.vmem [shape: bf16[32,96], index: 3, kind: input, shape index: {}]   ;;  %s2805_s4 = inlined_call_operand.vmem [shape: bf16[96,32], index: 4, kind: input, shape index: {}]   ;;  %s2806_s5 = inlined_call_operand.vmem [shape: bf16[32,32], index: 5, kind: input, shape index: {}]   ;;  %s2807_s6 = inlined_call_operand.vmem [shape: bf16[2,8,96], index: 6, kind: input, shape index: {}]   ;;  %s2808_s7 = inlined_call_operand.vmem [shape: f32[2,32,64], index: 7, kind: input, shape index: {}]   ;;  %s2809_s8 = inlined_call_operand.vmem [shape: f32[2,64,8], index: 8, kind: input, shape index: {}]   ;;  %s2810_s9 = inlined_call_operand.vmem [shape: f32[2,64,8], index: 9, kind: input, shape index: {}]   ;;  %s2811_s10 = inlined_call_operand.vmem [shape: f32[2,8,32], index: 10, kind: input, shape index: {}]   ;;  %s2812_s11 = inlined_call_operand.vmem [shape: f32[2,32], index: 11, kind: input, shape index: {}]   ;;  %s2813_s12 = inlined_call_operand.vmem [shape: f32[32,32], index: 12, kind: input, shape index: {}]   ;;  %s2814_s13 = inlined_call_operand.vmem [shape: f32[1,32], index: 13, kind: input, shape index: {}]   ;;  %s2815_s14 = inlined_call_operand.vmem [shape: f32[32,128], index: 14, kind: input, shape index: {}]   ;;  %s2816_s15 = inlined_call_operand.vmem [shape: f32[1,128], index: 15, kind: input, shape index: {}]   ;;  %s2817_s16 = inlined_call_operand.vmem [shape: f32[2,128], index: 16, kind: output, shape index: {}]  }
   0x1   :  { %2823 = sst [smem:[#allocation12_spill]] %s2801_s0  ;;  %s2530_s23 = smov 0  }
   0x2   :  { %2824 = sst [smem:[#allocation13_spill]] %s2804_s3  ;;  %s2532_s24 = smov 0  }
   0x3   :  { %2825 = sst [smem:[#allocation14_spill]] %s2812_s11  ;;  %s2534_s25 = smov 0  }
   0x4   :  { %2826 = sst [smem:[#allocation15_spill]] %s2814_s13 }
   0x5   :  { %2827 = sst [smem:[#allocation16_spill]] %s2815_s14 }
   0x6   :  { %2828 = sst [smem:[#allocation17_spill]] %s2816_s15 }
   0x7   :  { %2829 = sst [smem:[#allocation18_spill]] %s2817_s16 }
   0x8 LB: > { %2830 = sst [smem:[#allocation7_spill]] %s2426_s23  ;;  %s35_s26 = sadd.s32 1, %s2426_s23  ;;  %s2434_s25 = sphi %s2534_s25, %s26_s25   ;;  %s2430_s24 = sphi %s2532_s24, %s2847_s24   ;;  %s2426_s23 = sphi %s2530_s23, %s2846_s23   ;;  %s2422_s22 = sphi %s2528_s22, %s2845_s22   ;;  %s2418_s21 = sphi %s2526_s21, %s2844_s21  }
   0x9   : > { %2831 = sst [smem:[#allocation8_spill]] %s2430_s24  ;;  %s38_s27 = sadd.s32 1, %s2430_s24 }
   0xa   : > { %2832 = sst [smem:[#allocation9_spill]] %s2434_s25  ;;  %p36_p0 = scmp.ge.s32.totalorder %s35_s26, 2 }
   0xb   : > { %p2048_p1 = scmp.ge.s32.totalorder %s2434_s25, 1  ;;  %p529_p2 = scmp.lt.s32.totalorder %s2434_s25, 5 }
   0xc   : > { %s2849_s26 = smov (%p36_p0, %s35_s26), 0  ;;  %s2851_s27 = smov (!%p36_p0, %s38_s27), %s2430_s24 }
   0xd   : > { %2833 = sst [smem:[#allocation10_spill]] %s2849_s26  ;;  %p530_p3 = pnand %p2048_p1, %p529_p2 }
   0xe   : > { %p40_p4 = scmp.ge.s32.totalorder %s2851_s27, 2  ;;  %s2049_s28 = sshll.u32 (!%p530_p3), %s2418_s21, 1 }
   0xf   : > { %533 = sbr.rel (%p530_p3) target bundleno = 2052 (0x804), region = 84  ;;  %p614_p5 = scmp.lt.s32.totalorder (!%p530_p3), %s2422_s22, 1 }
  0x10   : > { %s2853_s27 = smov (%p40_p4, %s2851_s27), 0  ;;  %p603_p6 = scmp.lt.s32.totalorder (!%p530_p3), %s2049_s28, 3 }
  0x11   : > { %2834 = sst [smem:[#allocation11_spill]] %s2853_s27  ;;  %p638_p7 = scmp.eq.s32.totalorder (!%p530_p3), %s2422_s22, 0 }
  0x12   : > { %s2835_s3 = sld [smem:[#allocation13_spill]] (!%p530_p3)  ;;  %p639_p8 = scmp.eq.s32.totalorder (!%p530_p3), %s2418_s21, 0 }
  0x14   : > { %s615_s29 = scalar_select %p614_p5, %s2422_s22, 1 }
  0x15   : > { %s2855_s28 = smov (!%p603_p6, %s2049_s28), 3  ;;  %p640_p9 = pnand %p639_p8, %p638_p7 }
  0x16   : > { %s2053_s30 = sshll.u32 %s615_s29, 2  ;;  %s2105_s0 = sshll.u32 %s615_s29, 5 }
  0x17   : > { %s2050_s17 = sshll.u32 %s2855_s28, 2  ;;  %s2569_s20 = scalar_lea.vmem %s2807_s6, %s2053_s30 }
  0x18   : > { %s2574_s24 = scalar_lea.vmem %s2835_s3, %s2050_s17  ;;  %s2579_s16 = scalar_lea.vmem %s2806_s5, %s2050_s17 }
  0x19   : > { %s2584_s14 = scalar_lea.vmem %s2808_s7, %s2105_s0  ;;  %s2106_s28 = sshll.u32 %s615_s29, 6 }
  0x1a   : > { %s2589_s30 = scalar_lea.vmem %s2809_s8, %s2106_s28  ;;  %s2594_s27 = scalar_lea.vmem %s2810_s9, %s2106_s28 }
  0x1b   : > { %s2060_s3 = sshll.u32 %s615_s29, 3  ;;  %643 = sbr.rel (%p640_p9) target bundleno = 236 (0xec), region = 88 }
  0x1c   : > { %s2600_s17 = scalar_lea.vmem %s2811_s10, %s2060_s3  ;;  %s2836_s18 = sld [smem:[#allocation12_spill]] (!%p640_p9) }
  0x20   : > { %v648_v0 = vld [vmem:[%s2802_s1] sm:$0xff]  ;;  %vm656_vm0 = vcmask 64512   ;;  %vm779_vm1 = vcmask 261120  }
  0x21   : > { %2184 = vmatprep.subr.mxu0 %v648_v0  ;;  %2321 = vmatprep.subr.mxu1 %v648_v0  ;;  %v2061_v5 = vld [vmem:[%s2803_s2] ss:$0 sm:$0xff] }
  0x22   : > { %v644_v1 = vld [vmem:[%s2836_s18] sm:$0xff]  ;;  %v646_v2 = vld [vmem:[%s2836_s18 + $0x10] sm:$0xff]  ;;  %v645_v3 = vld [vmem:[%s2836_s18 + $0x8] sm:$0xff]  ;;  %2185 = vmatpush3.msra.mxu0 %v648_v0  ;;  %2322 = vmatpush3.msra.mxu1 %v648_v0 }
  0x23   : > { %v647_v4 = vld [vmem:[%s2836_s18 + $0x18] sm:$0xff]  ;;  %2186 = vmatprep.mubr.msk.f32.mxu0 %vm656_vm0, %v644_v1  ;;  %2189 = vmatprep.mubr.msk.f32.mxu1 %vm656_vm0, %v646_v2 }
  0x24   : > { %2187 = vmatmul.mubr.msk.f32.vlgmr.msra.gmra.mxu0 %vm656_vm0, %v645_v3  ;;  %2190 = vmatmul.mubr.msk.f32.vlgmr.msra.gmra.mxu1 %vm656_vm0, %v647_v4 }
  0xe4   : > { %v2188_v6 = vpop.f32.mrf.mxu0  ;;  %v2191_v7 = vpop.f32.mrf.mxu1 }
  0xe5   : > { %v741_v8 = vadd.f32 %v2188_v6, %v2061_v5  ;;  %v751_v9 = vadd.f32 %v2191_v7, %v2061_v5 }
  0xe6   : > { %v735_v10 = vpop.f32.mrf.mxu0  ;;  %v745_v11 = vpop.f32.mrf.mxu1 }
  0xe7   : > { %v755_v12 = vmax.f32 %v741_v8, 0.0  ;;  %v757_v13 = vmax.f32 %v751_v9, 0.0  ;;  %v736_v14 = vadd.f32 %v2061_v5, %v735_v10  ;;  %v746_v15 = vadd.f32 %v2061_v5, %v745_v11 }
  0xe9   : > { %781 = vst.msk [vmem:[#allocation2 + $0x8] sm:$0xff] %vm779_vm1, %v755_v12  ;;  %783 = vst.msk [vmem:[#allocation2 + $0x18] sm:$0xff] %vm779_vm1, %v757_v13  ;;  %v754_v16 = vmax.f32 %v736_v14, 0.0  ;;  %v756_v17 = vmax.f32 %v746_v15, 0.0 }
  0xeb   : > { %780 = vst.msk [vmem:[#allocation2] sm:$0xff] %vm779_vm1, %v754_v16  ;;  %782 = vst.msk [vmem:[#allocation2 + $0x10] sm:$0xff] %vm779_vm1, %v756_v17 }
  0xec PF: > { %p2066_p10 = scmp.ne.s32.totalorder %s2418_s21, 0 }
  0xee   : > { %786 = sbr.rel (%p2066_p10) target bundleno = 833 (0x341), region = 92 }
  0xf3   : > { %v857_v18 = vld [vmem:[%s2584_s14 + $0x18] sm:$0xff]  ;;  %v856_v19 = vld [vmem:[%s2584_s14 + $0x10] sm:$0xff]  ;;  %vm791_vm2 = vcmask 261120   ;;  %v787_v20 = vld [vmem:[#allocation2] sm:$0xff]  ;;  %v838_v9 = vlaneseq  ;;  %vm987_vm3 = vcmask 523264   ;;  %vm1207_vm4 = vcmask 64512  }
  0xf4   : > { %2192 = vmatprep.subr.mxu0 %v857_v18  ;;  %v788_v21 = vld [vmem:[#allocation2 + $0x8] sm:$0xff]  ;;  %v789_v23 = vld [vmem:[#allocation2 + $0x10] sm:$0xff]  ;;  %v790_v24 = vld [vmem:[#allocation2 + $0x18] sm:$0xff]  ;;  %v792_v25 = vsel %vm791_vm2, %v787_v20, 0.0 }
  0xf5   : > { %2193 = vmatpush3.msra.mxu0 %v857_v18  ;;  %v855_v22 = vld [vmem:[%s2584_s14 + $0x8] sm:$0xff]  ;;  %v793_v26 = vsel %vm791_vm2, %v788_v21, 0.0  ;;  %v795_v28 = vsel %vm791_vm2, %v789_v23, 0.0  ;;  %v986_v29 = vld [vmem:[%s2589_s30 + $0x38] sm:$0xff]  ;;  %v985_v30 = vld [vmem:[%s2589_s30 + $0x30] sm:$0xff]  ;;  %v797_v32 = vsel %vm791_vm2, %v790_v24, 0.0 }
  0xf6   : > { %2194 = vmatprep.subr.mxu0 %v856_v19  ;;  %v794_v27 = vadd.f32 %v793_v26, %v792_v25  ;;  %v854_v31 = vld [vmem:[%s2584_s14] sm:$0xff]  ;;  %2206 = vmatprep.subr.mxu1 %v986_v29  ;;  %v984_v34 = vld [vmem:[%s2589_s30 + $0x28] sm:$0xff]  ;;  %v2635_v35 = vld [vmem:[%s2594_s27 + $0x38] sm:$0xff]  ;;  %v839_v10 = vshrl.u32 %v838_v9, 7  ;;  %s2436_s14 = smov 96  }
  0xf7   : > { %2195 = vmatpush3.msra.mxu0 %v856_v19  ;;  %2207 = vmatpush3.msra.mxu1 %v986_v29  ;;  %v983_v37 = vld [vmem:[%s2589_s30 + $0x20] sm:$0xff]  ;;  %v982_v39 = vld [vmem:[%s2589_s30 + $0x18] sm:$0xff]  ;;  %v981_v41 = vld [vmem:[%s2589_s30 + $0x10] sm:$0xff] }
  0xf8   : > { %2196 = vmatprep.subr.mxu0 %v855_v22  ;;  %v796_v33 = vadd.f32 %v795_v28, %v794_v27  ;;  %2208 = vmatprep.subr.mxu1 %v985_v30  ;;  %v840_v11 = vsub.s32 0, %v839_v10  ;;  %v831_v12 = vld [vmem:[%s2600_s17] sm:$0xff]  ;;  %v848_v13 = vsub.s32 1, %v839_v10  ;;  %v1120_v28 = vld [vmem:[%s2594_s27 + $0x30] sm:$0xff] }
  0xf9   : > { %2197 = vmatpush3.msra.mxu0 %v855_v22  ;;  %2209 = vmatpush3.msra.mxu1 %v985_v30  ;;  %v1119_v30 = vld [vmem:[%s2594_s27 + $0x28] sm:$0xff] }
  0xfa   : > { %2198 = vmatprep.subr.mxu0 %v854_v31  ;;  %v798_v36 = vadd.f32 %v797_v32, %v796_v33  ;;  %2210 = vmatprep.subr.mxu1 %v984_v34  ;;  %v841_v14 = vrot.slane %v831_v12, %v840_v11  ;;  %v849_v16 = vrot.slane %v831_v12, %v848_v13  ;;  %v1117_v32 = vld [vmem:[%s2594_s27 + $0x18] sm:$0xff]  ;;  %v1116_v33 = vld [vmem:[%s2594_s27 + $0x10] sm:$0xff] }
  0xfb   : > { %2199 = vmatpush3.msra.mxu0 %v854_v31  ;;  %2211 = vmatpush3.msra.mxu1 %v984_v34  ;;  %v1118_v31 = vld [vmem:[%s2594_s27 + $0x20] sm:$0xff]  ;;  %v980_v34 = vld [vmem:[%s2589_s30 + $0x8] sm:$0xff] }
  0xfc   : > { %v799_v38 = vrot.slane %v798_v36, 4  ;;  %2228 = vmatprep.subr.mxu0 %v2635_v35  ;;  %2212 = vmatprep.subr.mxu1 %v983_v37 }
  0xfd   : > { %2213 = vmatpush3.msra.mxu1 %v983_v37  ;;  %v1114_v37 = vld [vmem:[%s2594_s27] sm:$0xff] }
  0xfe   : > { %v800_v40 = vadd.f32 %v799_v38, %v798_v36  ;;  %2214 = vmatprep.subr.mxu1 %v982_v39  ;;  %v979_v36 = vld [vmem:[%s2589_s30] sm:$0xff] }
  0xff   : > { %2215 = vmatpush3.msra.mxu1 %v982_v39 }
 0x100   : > { %v801_v42 = vrot.slane %v800_v40, 2  ;;  %2216 = vmatprep.subr.mxu1 %v981_v41 }
 0x101   : > { %2217 = vmatpush3.msra.mxu1 %v981_v41 }
 0x102   : > { %v802_v43 = vadd.f32 %v801_v42, %v800_v40  ;;  %2218 = vmatprep.subr.mxu1 %v980_v34 }
 0x103   : > { %2219 = vmatpush3.msra.mxu1 %v980_v34 }
 0x104   : > { %v803_v44 = vrot.slane %v802_v43, 1  ;;  %2220 = vmatprep.subr.mxu1 %v979_v36 }
 0x105   : > { %2221 = vmatpush3.msra.mxu1 %v979_v36 }
 0x106   : > { %v804_v45 = vadd.f32 %v803_v44, %v802_v43 }
 0x108   : > { %v805_v46 = vmul.f32 0.03125, %v804_v45 }
 0x10a   : > { %v806_v47 = vsub.f32 %v787_v20, %v805_v46  ;;  %v807_v48 = vsub.f32 %v788_v21, %v805_v46  ;;  %v808_v49 = vsub.f32 %v789_v23, %v805_v46  ;;  %v809_v50 = vsub.f32 %v790_v24, %v805_v46 }
 0x10b   : > { %v827_v1 = vmul.f32 0.0, %v805_v46 }
 0x10c   : > { %v810_v51 = vmul.f32 %v806_v47, %v806_v47  ;;  %v811_v52 = vmul.f32 %v807_v48, %v807_v48  ;;  %v812_v53 = vmul.f32 %v808_v49, %v808_v49  ;;  %v813_v54 = vmul.f32 %v809_v50, %v809_v50 }
 0x10d   : > { %v828_v4 = vmul.f32 %v827_v1, %v805_v46 }
 0x10e   : > { %v814_v55 = vsel %vm791_vm2, %v810_v51, 0.0  ;;  %v815_v56 = vsel %vm791_vm2, %v811_v52, 0.0  ;;  %v817_v57 = vsel %vm791_vm2, %v812_v53, 0.0  ;;  %v819_v59 = vsel %vm791_vm2, %v813_v54, 0.0 }
 0x10f   : > { %v816_v58 = vadd.f32 %v815_v56, %v814_v55 }
 0x111   : > { %v818_v60 = vadd.f32 %v817_v57, %v816_v58 }
 0x113   : > { %v820_v61 = vadd.f32 %v819_v59, %v818_v60 }
 0x115   : > { %v821_v62 = vrot.slane %v820_v61, 4 }
 0x117   : > { %v822_v63 = vadd.f32 %v821_v62, %v820_v61 }
 0x119   : > { %v823_v0 = vrot.slane %v822_v63, 2 }
 0x11b   : > { %v824_v2 = vadd.f32 %v823_v0, %v822_v63 }
 0x11d   : > { %v825_v3 = vrot.slane %v824_v2, 1 }
 0x11f   : > { %v826_v5 = vadd.f32 %v825_v3, %v824_v2 }
 0x121   : > { %v829_v6 = vsub.f32 %v826_v5, %v828_v4 }
 0x123   : > { %v830_v7 = vmul.f32 0.03125, %v829_v6 }
 0x125   : > { %v832_v8 = vadd.f32 1e-05, %v830_v7 }
 0x127   : > { %2369 = vrsqrt.f32 %v832_v8 }
 0x134   : > { %v2370_v15 = vpop.eup %2369 }
 0x135   : > { %v834_v17 = vmul.f32 %v2370_v15, %v806_v47  ;;  %v835_v18 = vmul.f32 %v2370_v15, %v807_v48  ;;  %v836_v19 = vmul.f32 %v2370_v15, %v808_v49  ;;  %v837_v20 = vmul.f32 %v2370_v15, %v809_v50 }
 0x137   : > { %v842_v21 = vmul.f32 %v841_v14, %v834_v17  ;;  %v843_v22 = vmul.f32 %v841_v14, %v835_v18  ;;  %v844_v23 = vmul.f32 %v841_v14, %v836_v19  ;;  %v845_v24 = vmul.f32 %v841_v14, %v837_v20 }
 0x139   : > { %v850_v25 = vadd.f32 %v849_v16, %v842_v21  ;;  %v851_v26 = vadd.f32 %v849_v16, %v843_v22  ;;  %v852_v27 = vadd.f32 %v849_v16, %v844_v23  ;;  %v853_v29 = vadd.f32 %v849_v16, %v845_v24 }
 0x13b   : > { %2200 = vmatprep.mubr.msk.f32.mxu0 %vm791_vm2, %v850_v25 }
 0x13c   : > { %2201 = vmatmul.mubr.msk.f32.vlgmr.msra.gmra.mxu0 %vm791_vm2, %v851_v26 }
 0x13d   : > { %2203 = vmatprep.mubr.msk.f32.mxu0 %vm791_vm2, %v852_v27  ;;  %2229 = vmatpush3.msra.mxu0 %v2635_v35  ;;  %v1115_v35 = vld [vmem:[%s2594_s27 + $0x8] sm:$0xff] }
 0x13e   : > { %2230 = vmatprep.subr.mxu0 %v1120_v28 }
 0x13f   : > { %2231 = vmatpush3.msra.mxu0 %v1120_v28 }
 0x140   : > { %2204 = vmatmul.mubr.msk.f32.gmra.mxu0 %vm791_vm2, %v853_v29  ;;  %2232 = vmatprep.subr.mxu0 %v1119_v30 }
 0x141   : > { %2233 = vmatpush3.msra.mxu0 %v1119_v30 }
 0x142   : > { %2234 = vmatprep.subr.mxu0 %v1118_v31 }
 0x143   : > { %2235 = vmatpush3.msra.mxu0 %v1118_v31 }
 0x144   : > { %2236 = vmatprep.subr.mxu0 %v1117_v32 }
 0x145   : > { %2237 = vmatpush3.msra.mxu0 %v1117_v32 }
 0x146   : > { %2238 = vmatprep.subr.mxu0 %v1116_v33 }
 0x147   : > { %2239 = vmatpush3.msra.mxu0 %v1116_v33 }
 0x148   : > { %2240 = vmatprep.subr.mxu0 %v1115_v35 }
 0x149   : > { %2241 = vmatpush3.msra.mxu0 %v1115_v35 }
 0x14a   : > { %2242 = vmatprep.subr.mxu0 %v1114_v37 }
 0x14b   : > { %2243 = vmatpush3.msra.mxu0 %v1114_v37 }
 0x1fc   : > { %v2202_v38 = vpop.f32.mrf.mxu0 }
 0x1fd   : > { %972 = vst.msk [vmem:[#allocation4 + $0x8] sm:$0xff] %vm791_vm2, %v2202_v38  ;;  %961 = vrot.lane.b32.xlu0 %v2202_v38, %s2436_s14 }
 0x1fe   : > { %v936_v39 = vpop.f32.mrf.mxu0 }
 0x1ff   : > { %971 = vst.msk [vmem:[#allocation4] sm:$0xff] %vm791_vm2, %v936_v39  ;;  %2222 = vmatprep.mubr.msk.f32.mxu1 %vm987_vm3, %v936_v39  ;;  %2244 = vmatprep.mubr.msk.f32.mxu0 %vm987_vm3, %v936_v39 }
 0x200   : > { %v2205_v40 = vpop.f32.mrf.mxu0  ;;  %2223 = vmatmul.mubr.msk.f32.vlgmr.msra.gmra.mxu1 %vm987_vm3, %v2202_v38  ;;  %2245 = vmatmul.mubr.msk.f32.vlgmr.msra.gmra.mxu0 %vm987_vm3, %v2202_v38 }
 0x201   : > { %974 = vst.msk [vmem:[#allocation4 + $0x18] sm:$0xff] %vm791_vm2, %v2205_v40  ;;  %959 = vrot.lane.b32.xlu0 %v936_v39, %s2436_s14 }
 0x202   : > { %v946_v41 = vpop.f32.mrf.mxu0 }
 0x203   : > { %973 = vst.msk [vmem:[#allocation4 + $0x10] sm:$0xff] %vm791_vm2, %v946_v41  ;;  %963 = vrot.lane.b32.xlu1 %v946_v41, %s2436_s14  ;;  %2225 = vmatprep.mubr.msk.f32.mxu1 %vm987_vm3, %v946_v41 }
 0x204   : > { %2247 = vmatprep.mubr.msk.f32.mxu0 %vm987_vm3, %v946_v41  ;;  %2226 = vmatmul.mubr.msk.f32.gmra.mxu1 %vm987_vm3, %v2205_v40 }
 0x205   : > { %2248 = vmatmul.mubr.msk.f32.gmra.mxu0 %vm987_vm3, %v2205_v40 }
 0x207   : > { %965 = vrot.lane.b32.xlu1 %v2205_v40, %s2436_s14 }
 0x26f   : > { %v962_v42 = vpop.permute.xlu0 %961 }
 0x270   : > { %976 = vst.msk [vmem:[#allocation4 + $0x28] sm:$0xff] %vm791_vm2, %v962_v42 }
 0x273   : > { %v960_v43 = vpop.permute.xlu0 %959 }
 0x274   : > { %975 = vst.msk [vmem:[#allocation4 + $0x20] sm:$0xff] %vm791_vm2, %v960_v43 }
 0x275   : > { %v964_v44 = vpop.permute.xlu1 %963 }
 0x276   : > { %977 = vst.msk [vmem:[#allocation4 + $0x30] sm:$0xff] %vm791_vm2, %v964_v44 }
 0x279   : > { %v966_v45 = vpop.permute.xlu1 %965 }
 0x27a   : > { %978 = vst.msk [vmem:[#allocation4 + $0x38] sm:$0xff] %vm791_vm2, %v966_v45 }
 0x2c0   : > { %v2224_v46 = vpop.f32.mrf.mxu1  ;;  %v2246_v47 = vpop.f32.mrf.mxu0 }
 0x2c1   : > { %1209 = vst.msk [vmem:[#allocation6 + $0x8] sm:$0xff] %vm1207_vm4, %v2246_v47 }
 0x2c2   : > { %v1062_v48 = vpop.f32.mrf.mxu1  ;;  %v1188_v49 = vpop.f32.mrf.mxu0 }
 0x2c3   : > { %1208 = vst.msk [vmem:[#allocation6] sm:$0xff] %vm1207_vm4, %v1188_v49  ;;  %1081 = vxpose.xlu0.b32.start [1/4] (short) (narrow) %v1062_v48, 8 }
 0x2c4   : > { %v2227_v51 = vpop.f32.mrf.mxu1 }
 0x2c5   : > { %v2249_v50 = vpop.f32.mrf.mxu0 }
 0x2c6   : > { %1211 = vst.msk [vmem:[#allocation6 + $0x18] sm:$0xff] %vm1207_vm4, %v2249_v50  ;;  %v1072_v53 = vpop.f32.mrf.mxu1 }
 0x2c7   : > { %v1198_v52 = vpop.f32.mrf.mxu0  ;;  %1082 = vxpose.xlu0.b32.cont [2/4] (short) (narrow) %v2224_v46, 8 }
 0x2c8   : > { %1210 = vst.msk [vmem:[#allocation6 + $0x10] sm:$0xff] %vm1207_vm4, %v1198_v52 }
 0x2cb   : > { %1083 = vxpose.xlu0.b32.cont [3/4] (short) (narrow) %v1072_v53, 8 }
 0x2cf   : > { %1084 = vxpose.xlu0.b32.end [4/4] (short) (narrow) %v2227_v51, 8 }
 0x33f   : > { %v1097_v54 = vpop.trf.xlu0 }
 0x340   : > { %1113 = vst.msk [vmem:[#allocation5] sm:$0xff] %vm791_vm2, %v1097_v54 }
 0x341 PF: > { %v2374_v55 = vld [vmem:[%s2805_s4 + $0x28] sm:$0xff]   ;;  %v1218_v56 = vlaneseq  ;;  %v2375_v57 = vld [vmem:[%s2805_s4 + $0x20] sm:$0xff]   ;;  %v2437_v59 = vmov 0   ;;  %s2686_s0 = sshll.u32 %s2418_s21, 4  ;;  %v2376_v60 = vld [vmem:[%s2805_s4 + $0x18] sm:$0xff]   ;;  %v2438_v5 = vmov 1  }
 0x342   : > { %2250 = vmatprep.subr.bf16.mxu0 %v2374_v55  ;;  %2371 = vset.pattern.permute.xlu0 %v2437_v59  ;;  %v1214_v62 = vld [vmem:[%s2569_s20] sm:$0xf]  ;;  %s1356_s3 = scalar_lea.vmem [#allocation6], %s2686_s0  ;;  %v2377_v2 = vld [vmem:[%s2805_s4 + $0x10] sm:$0xff]   ;;  %v1213_v8 = vld [vmem:[%s2574_s24 + $0x4] sm:$0xf] }
 0x343   : > { %v2683_v58 = vshrl.u32 %v1218_v56, 7  ;;  %2251 = vmatpush3.bf16.msra.mxu0 %v2374_v55  ;;  %v1216_v63 = vpack.i.b16 %v1214_v62, %v1214_v62  ;;  %v1228_v0 = vshrl.u32 %v1214_v62, 16  ;;  %v1357_v1 = vld [vmem:[%s1356_s3] sm:$0xff]  ;;  %2372 = vset.pattern.permute.xlu1 %v2438_v5  ;;  %v1358_v6 = vld [vmem:[%s1356_s3 + $0x8] sm:$0xff]  ;;  %vm1299_vm5 = vcmask 785408   ;;  %v1412_v59 = vld [vmem:[#allocation4 + $0x10] sm:$0xff] }
 0x344   : > { %2252 = vmatprep.subr.bf16.mxu0 %v2375_v57  ;;  %1367 = vperm.xlu0 %2371, %v1357_v1   ;;  %v1212_v7 = vld [vmem:[%s2574_s24] sm:$0xf]  ;;  %v2378_v11 = vld [vmem:[%s2805_s4 + $0x8] sm:$0xff]   ;;  %vm1391_vm10 = vcmask 261120   ;;  %v1547_v62 = vld [vmem:[#allocation4 + $0x38] sm:$0xff]  ;;  %p1662_p11 = scmp.eq.s32.totalorder %s2418_s21, 1 }
 0x345   : > { %v1220_v61 = vsub.s32 0, %v2683_v58  ;;  %v1229_v4 = vpack.i.b16 %v1228_v0, %v1228_v0  ;;  %1503 = vperm.xlu1 %2372, %v1357_v1   ;;  %v2379_v16 = vld [vmem:[%s2805_s4] sm:$0xff]  }
 0x346   : > { %v2109_v34 = vld [vmem:[%s2579_s16] sm:$0xff]   ;;  %p2723_p12 = pnand %p1662_p11, %p614_p5 }
 0x347   : > { %2253 = vmatpush3.bf16.msra.mxu0 %v2375_v57  ;;  %v1221_v3 = vrot.slane %v1216_v63, %v1220_v61  ;;  %v1234_v10 = vrot.slane %v1229_v4, %v1220_v61  ;;  %v2095_v21 = vld [vmem:[#allocation5 + $0x1] ss:$0 sm:$0xff]  ;;  %v2092_v22 = vld [vmem:[#allocation5] ss:$0 sm:$0xff]  ;;  %v2110_v40 = vunpack.c.l.bf16 %v2109_v34  ;;  %v2111_v49 = vunpack.c.h.bf16 %v2109_v34  ;;  %v1413_v57 = vld [vmem:[#allocation4 + $0x18] sm:$0xff] }
 0x348   : > { %2254 = vmatprep.subr.bf16.mxu0 %v2376_v60  ;;  %1372 = vperm.xlu0 %2371, %v1358_v6   ;;  %v1410_v61 = vld [vmem:[#allocation4] sm:$0xff] }
 0x349   : > { %v2079_v9 = vcombine.low %v1221_v3, %v1221_v3  ;;  %v2080_v14 = vcombine.low %v1234_v10, %v1234_v10  ;;  %1507 = vperm.xlu1 %2372, %v1358_v6   ;;  %2266 = vmatprep.subr.mxu1 %v1413_v57 }
 0x34a   : > { %2267 = vmatpush3.msra.mxu1 %v1413_v57 }
 0x34b   : > { %2255 = vmatpush3.bf16.msra.mxu0 %v2376_v60  ;;  %v1226_v12 = vmul.bf16 %v2079_v9, %v1212_v7  ;;  %v1227_v13 = vmul.bf16 %v2079_v9, %v1213_v8  ;;  %v1239_v17 = vmul.bf16 %v2080_v14, %v1212_v7  ;;  %v1240_v18 = vmul.bf16 %v2080_v14, %v1213_v8  ;;  %v1411_v60 = vld [vmem:[#allocation4 + $0x8] sm:$0xff] }
 0x34c   : > { %2256 = vmatprep.subr.bf16.mxu0 %v2377_v2  ;;  %2373 = vset.pattern.permute.xlu0 %v2438_v5 }
 0x34d   : > { %v2081_v15 = vcombine.low %v1226_v12, %v1227_v13  ;;  %v2082_v19 = vcombine.low %v1239_v17, %v1240_v18  ;;  %2268 = vmatprep.subr.mxu1 %v1412_v59  ;;  %v1545_v18 = vld [vmem:[#allocation4 + $0x28] sm:$0xff] }
 0x34e   : > { %2269 = vmatpush3.msra.mxu1 %v1412_v59 }
 0x34f   : > { %2257 = vmatpush3.bf16.msra.mxu0 %v2377_v2  ;;  %2262 = vmatprep.mubr.msk.bf16.mxu0 %vm1299_vm5, %v2081_v15 }
 0x350   : > { %2258 = vmatprep.subr.bf16.mxu0 %v2378_v11  ;;  %2270 = vmatprep.subr.mxu1 %v1411_v60 }
 0x351   : > { %2271 = vmatpush3.msra.mxu1 %v1411_v60 }
 0x352   : > { %2272 = vmatprep.subr.mxu1 %v1410_v61 }
 0x353   : > { %2259 = vmatpush3.bf16.msra.mxu0 %v2378_v11  ;;  %2273 = vmatpush3.msra.mxu1 %v1410_v61 }
 0x354   : > { %2260 = vmatprep.subr.bf16.mxu0 %v2379_v16  ;;  %2277 = vmatprep.subr.mxu1 %v1547_v62 }
 0x357   : > { %2261 = vmatpush3.bf16.msra.mxu0 %v2379_v16  ;;  %v1546_v16 = vld [vmem:[#allocation4 + $0x30] sm:$0xff] }
 0x35a   : > { %2263 = vmatmul.mubr.msk.bf16.vlgmr.msra.gmra.mxu0 %vm1299_vm5, %v2082_v19 }
 0x3bf   : > { %v1368_v23 = vpop.permute.xlu0 %1367 }
 0x3c0   : > { %v1504_v20 = vpop.permute.xlu1 %1503  ;;  %v1379_v26 = vadd.f32 %v2092_v22, %v1368_v23 }
 0x3c1   : > { %v1514_v24 = vadd.f32 %v2095_v21, %v1504_v20  ;;  %v1544_v20 = vld [vmem:[#allocation4 + $0x20] sm:$0xff] }
 0x3c3   : > { %v1373_v30 = vpop.permute.xlu0 %1372 }
 0x3c4   : > { %v1508_v25 = vpop.permute.xlu1 %1507  ;;  %v1380_v36 = vadd.f32 %v2092_v22, %v1373_v30 }
 0x3c5   : > { %v1515_v29 = vadd.f32 %v2095_v21, %v1508_v25 }
 0x41a   : > { %v2264_v27 = vpop.f32.mrf.mxu0 }
 0x41b   : > { %v1516_v28 = vadd.f32 %v2264_v27, %v1514_v24 }
 0x41c   : > { %v1340_v31 = vpop.f32.mrf.mxu0 }
 0x41d   : > { %v1520_v32 = vmul.f32 0.2, %v1516_v28  ;;  %v1381_v33 = vadd.f32 %v1379_v26, %v1340_v31  ;;  %vm1518_vm6 = vcmp.ge.f32.partialorder %v1516_v28, 0.0  ;;  %v1637_v31 = vadd.s32 8, %v2683_v58 }
 0x41e   : > { %v2265_v35 = vpop.f32.mrf.mxu0 }
 0x41f   : > { %vm1383_vm7 = vcmp.ge.f32.partialorder %v1381_v33, 0.0  ;;  %v1385_v37 = vmul.f32 0.2, %v1381_v33  ;;  %v1517_v38 = vadd.f32 %v2265_v35, %v1515_v29  ;;  %v1522_v44 = vsel %vm1518_vm6, %v1516_v28, %v1520_v32  ;;  %v1363_v32 = vld [vmem:[%s2600_s17] sm:$0xff]  ;;  %s1659_s17 = scalar_lea.vmem [#allocation3], %s2686_s0 }
 0x420   : > { %v1343_v39 = vpop.f32.mrf.mxu0  ;;  %v1524_v48 = vadd.f32 %v2110_v40, %v1522_v44  ;;  %v1645_v29 = vsub.s32 2, %v2683_v58  ;;  %v1638_v35 = vstv %s2686_s0 }
 0x421   : > { %v1521_v41 = vmul.f32 0.2, %v1517_v38  ;;  %v1382_v42 = vadd.f32 %v1380_v36, %v1343_v39  ;;  %v1387_v43 = vsel %vm1383_vm7, %v1381_v33, %v1385_v37  ;;  %vm1519_vm8 = vcmp.ge.f32.partialorder %v1517_v38, 0.0 }
 0x422   : > { %v1389_v45 = vadd.f32 %v2110_v40, %v1387_v43  ;;  %v1526_v53 = vsel %vm1391_vm10, %v1524_v48, -inf  ;;  %v1640_v44 = vadd.s32 %v1638_v35, %v1637_v31 }
 0x423   : > { %vm1384_vm9 = vcmp.ge.f32.partialorder %v1382_v42, 0.0  ;;  %v1386_v46 = vmul.f32 0.2, %v1382_v42  ;;  %v1523_v51 = vsel %vm1519_vm8, %v1517_v38, %v1521_v41 }
 0x424   : > { %v1392_v47 = vsel %vm1391_vm10, %v1389_v45, -inf  ;;  %v1525_v55 = vadd.f32 %v2111_v49, %v1523_v51  ;;  %vm1652_vm11 = vcmp.lt.s32.totalorder %v1640_v44, 32 }
 0x425   : > { %1393 = vmax.xlane.f32.xlu0 %v1392_v47  ;;  %v1388_v50 = vsel %vm1384_vm9, %v1382_v42, %v1386_v46  ;;  %v1646_v42 = vrot.slane %v1363_v32, %v1645_v29  ;;  %v1639_v47 = vadd.s32 %v1638_v35, %v2683_v58 }
 0x426   : > { %v1390_v52 = vadd.f32 %v2111_v49, %v1388_v50  ;;  %v1529_v56 = vsel %vm1391_vm10, %v1525_v55, -inf }
 0x427   : > { %vm1651_vm12 = vcmp.lt.s32.totalorder %v1639_v47, 32 }
 0x428   : > { %v1395_v54 = vsel %vm1391_vm10, %v1390_v52, -inf }
 0x429   : > { %1527 = vmax.xlane.f32.xlu0 %v1526_v53  ;;  %1396 = vmax.xlane.f32.xlu1 %v1395_v54 }
 0x42d   : > { %1530 = vmax.xlane.f32.xlu0 %v1529_v56 }
 0x4ae   : > { %v1394_v63 = vpop.xlane.xlu0 %1393 }
 0x4af   : > { %v1398_v0 = vsub.f32 %v1389_v45, %v1394_v63 }
 0x4b1   : > { %v1400_v1 = vmul.f32 1.442695, %v1398_v0 }
 0x4b2   : > { %v1528_v2 = vpop.xlane.xlu0 %1527  ;;  %v1397_v3 = vpop.xlane.xlu1 %1396 }
 0x4b3   : > { %2380 = vpow2.f32 %v1400_v1  ;;  %v1532_v4 = vsub.f32 %v1524_v48, %v1528_v2  ;;  %v1399_v5 = vsub.f32 %v1390_v52, %v1397_v3 }
 0x4b5   : > { %v1534_v6 = vmul.f32 1.442695, %v1532_v4  ;;  %v1402_v7 = vmul.f32 1.442695, %v1399_v5 }
 0x4b6   : > { %v1531_v8 = vpop.xlane.xlu0 %1530 }
 0x4b7   : > { %2382 = vpow2.f32 %v1534_v6  ;;  %v1533_v9 = vsub.f32 %v1525_v55, %v1531_v8 }
 0x4b8   : > { %2384 = vpow2.f32 %v1402_v7 }
 0x4b9   : > { %v1536_v10 = vmul.f32 1.442695, %v1533_v9 }
 0x4bb   : > { %2386 = vpow2.f32 %v1536_v10 }
 0x4c0   : > { %v2381_v11 = vpop.eup %2380 }
 0x4c1   : > { %2274 = vmatprep.mubr.msk.f32.mxu1 %vm1391_vm10, %v2381_v11  ;;  %v1404_v12 = vsel %vm1391_vm10, %v2381_v11, 0.0 }
 0x4c2   : > { %1405 = vadd.xlane.f32.xlu1 %v1404_v12 }
 0x4c4   : > { %v2383_v13 = vpop.eup %2382 }
 0x4c5   : > { %v2385_v14 = vpop.eup %2384  ;;  %v1538_v15 = vsel %vm1391_vm10, %v2383_v13, 0.0 }
 0x4c6   : > { %2275 = vmatmul.mubr.msk.f32.vlgmr.msra.gmra.mxu1 %vm1391_vm10, %v2385_v14  ;;  %1539 = vadd.xlane.f32.xlu1 %v1538_v15  ;;  %v1407_v17 = vsel %vm1391_vm10, %v2385_v14, 0.0 }
 0x4c7   : > { %2278 = vmatpush3.msra.mxu1 %v1547_v62  ;;  %2285 = vmatprep.mubr.msk.f32.mxu1 %vm1391_vm10, %v2383_v13 }
 0x4c8   : > { %v2387_v19 = vpop.eup %2386  ;;  %2279 = vmatprep.subr.mxu1 %v1546_v16  ;;  %1408 = vadd.xlane.f32.xlu0 %v1407_v17 }
 0x4c9   : > { %2280 = vmatpush3.msra.mxu1 %v1546_v16  ;;  %v1541_v21 = vsel %vm1391_vm10, %v2387_v19, 0.0 }
 0x4ca   : > { %2281 = vmatprep.subr.mxu1 %v1545_v18 }
 0x4cb   : > { %2282 = vmatpush3.msra.mxu1 %v1545_v18 }
 0x4cc   : > { %2283 = vmatprep.subr.mxu1 %v1544_v20  ;;  %1542 = vadd.xlane.f32.xlu0 %v1541_v21 }
 0x4cd   : > { %2284 = vmatpush3.msra.mxu1 %v1544_v20 }
 0x4ce   : > { %2286 = vmatmul.mubr.msk.f32.vlgmr.msra.gmra.mxu1 %vm1391_vm10, %v2387_v19 }
 0x54b   : > { %v1406_v23 = vpop.xlane.xlu1 %1405 }
 0x54f   : > { %v1540_v25 = vpop.xlane.xlu1 %1539 }
 0x551   : > { %v1409_v22 = vpop.xlane.xlu0 %1408 }
 0x552   : > { %2388 = vrcp.f32 %v1409_v22 }
 0x555   : > { %v1543_v24 = vpop.xlane.xlu0 %1542 }
 0x556   : > { %2390 = vrcp.f32 %v1543_v24 }
 0x557   : > { %2392 = vrcp.f32 %v1406_v23 }
 0x558   : > { %2394 = vrcp.f32 %v1540_v25 }
 0x55f   : > { %v2389_v28 = vpop.eup %2388 }
 0x563   : > { %v2391_v30 = vpop.eup %2390 }
 0x564   : > { %v2393_v34 = vpop.eup %2392 }
 0x565   : > { %v2395_v38 = vpop.eup %2394 }
 0x586   : > { %v2276_v26 = vpop.f32.mrf.mxu1 }
 0x587   : > { %v1498_v36 = vmul.f32 %v2389_v28, %v2276_v26 }
 0x588   : > { %v1486_v27 = vpop.f32.mrf.mxu1 }
 0x589   : > { %v1497_v40 = vmul.f32 %v2393_v34, %v1486_v27 }
 0x58e   : > { %v2287_v33 = vpop.f32.mrf.mxu1 }
 0x58f   : > { %v1632_v37 = vmul.f32 %v2391_v30, %v2287_v33 }
 0x590   : > { %v1620_v39 = vpop.f32.mrf.mxu1 }
 0x591   : > { %v1634_v41 = vadd.f32 %v1632_v37, %v1498_v36  ;;  %v1631_v43 = vmul.f32 %v2395_v38, %v1620_v39 }
 0x593   : > { %v1642_v45 = vmul.f32 0.5, %v1634_v41  ;;  %v1633_v46 = vadd.f32 %v1631_v43, %v1497_v40 }
 0x595   : > { %v1648_v48 = vadd.f32 %v1646_v42, %v1642_v45  ;;  %v1641_v49 = vmul.f32 0.5, %v1633_v46 }
 0x597   : > { %v1650_v50 = vmax.f32 %v1648_v48, 0.0  ;;  %v1647_v51 = vadd.f32 %v1646_v42, %v1641_v49 }
 0x598   : > { %1667 = sbr.rel (%p2723_p12) target bundleno = 1446 (0x5a6), region = 96 }
 0x599   : > { %v1658_v52 = vsel %vm1652_vm11, %v1650_v50, 0.0  ;;  %v1649_v53 = vmax.f32 %v1647_v51, 0.0 }
 0x59a   : > { %1661 = vst.msk [vmem:[%s1659_s17 + $0x8] sm:$0xff] %vm1391_vm10, %v1658_v52 }
 0x59b   : > { %v1657_v54 = vsel %vm1651_vm12, %v1649_v53, 0.0 }
 0x59c   : > { %1660 = vst.msk [vmem:[%s1659_s17] sm:$0xff] %vm1391_vm10, %v1657_v54 }
 0x5a3   : > { %v1668_v55 = vld [vmem:[#allocation3] sm:$0xff]  ;;  %v1669_v56 = vld [vmem:[#allocation3 + $0x8] sm:$0xff]  ;;  %v1670_v58 = vld [vmem:[#allocation3 + $0x10] sm:$0xff] }
 0x5a4   : > { %1672 = vst.msk [vmem:[#allocation2] sm:$0xff] %vm1391_vm10, %v1668_v55  ;;  %1673 = vst.msk [vmem:[#allocation2 + $0x8] sm:$0xff] %vm1391_vm10, %v1669_v56  ;;  %v1671_v57 = vld [vmem:[#allocation3 + $0x18] sm:$0xff] }
 0x5a5   : > { %1674 = vst.msk [vmem:[#allocation2 + $0x10] sm:$0xff] %vm1391_vm10, %v1670_v58  ;;  %1675 = vst.msk [vmem:[#allocation2 + $0x18] sm:$0xff] %vm1391_vm10, %v1671_v57 }
 0x5a6 PF: > { %p1676_p13 = scmp.eq.s32.totalorder %s2422_s22, 1 }
 0x5a8   : > { %p1677_p0 = pnand %p1676_p13, %p1662_p11 }
 0x5a9   : > { %s2838_s0 = sld [smem:[#allocation14_spill]] (!%p1677_p0) }
 0x5aa   : > { %1680 = sbr.rel (%p1677_p0) target bundleno = 2052 (0x804), region = 100  ;;  %s2839_s26 = sld [smem:[#allocation16_spill]] (!%p1677_p0) }
 0x5ab   : > { %s2840_s30 = sld [smem:[#allocation15_spill]] (!%p1677_p0) }
 0x5ac   : > { %s2841_s22 = sld [smem:[#allocation17_spill]] (!%p1677_p0) }
 0x5af   : > { %v1685_v59 = vld [vmem:[#allocation3 + $0x18] sm:$0xff]  ;;  %v2439_v60 = vmov 0.0   ;;  %v1684_v61 = vld [vmem:[#allocation3 + $0x10] sm:$0xff]  ;;  %vm2440_vm13 = vmmov 0   ;;  %v1683_v0 = vld [vmem:[#allocation3 + $0x8] sm:$0xff] }
 0x5b0   : > { %2288 = vmatprep.subr.mxu0 %v2439_v60  ;;  %2296 = vmatprep.mubr.msk.f32.mxu0 %vm2440_vm13, %v2439_v60  ;;  %v1762_v62 = vld [vmem:[%s2813_s12 + $0x18] sm:$0xff]  ;;  %v1761_v63 = vld [vmem:[%s2813_s12 + $0x10] sm:$0xff]  ;;  %v1760_v1 = vld [vmem:[%s2813_s12 + $0x8] sm:$0xff] }
 0x5b1   : > { %2289 = vmatpush3.msra.mxu0 %v1685_v59  ;;  %2299 = vmatprep.subr.mxu1 %v2439_v60  ;;  %v1682_v2 = vld [vmem:[#allocation3] sm:$0xff]  ;;  %v1847_v5 = vld [vmem:[%s2839_s26 + $0x18] sm:$0xff]  ;;  %v1846_v8 = vld [vmem:[%s2839_s26 + $0x10] sm:$0xff] }
 0x5b2   : > { %2290 = vmatprep.subr.mxu0 %v2439_v60  ;;  %2300 = vmatpush3.msra.mxu1 %v1762_v62  ;;  %v1681_v3 = vld [vmem:[%s2838_s0] sm:$0x3]  ;;  %v1845_v9 = vld [vmem:[%s2839_s26 + $0x8] sm:$0xff]  ;;  %s2842_s0 = sld [smem:[#allocation18_spill]] }
 0x5b3   : > { %2291 = vmatpush3.msra.mxu0 %v1684_v61  ;;  %2301 = vmatprep.subr.mxu1 %v2439_v60  ;;  %v1759_v4 = vld [vmem:[%s2813_s12] sm:$0xff] }
 0x5b4   : > { %2292 = vmatprep.subr.mxu0 %v2439_v60  ;;  %2302 = vmatpush3.msra.mxu1 %v1761_v63  ;;  %v1844_v10 = vld [vmem:[%s2839_s26] sm:$0xff] }
 0x5b5   : > { %2293 = vmatpush3.msra.mxu0 %v1683_v0  ;;  %2303 = vmatprep.subr.mxu1 %v2439_v60  ;;  %v2099_v11 = vld [vmem:[%s2840_s30] ss:$0 sm:$0xff] }
 0x5b6   : > { %2294 = vmatprep.subr.mxu0 %v2439_v60  ;;  %2304 = vmatpush3.msra.mxu1 %v1760_v1  ;;  %v2101_v16 = vld [vmem:[%s2841_s22] ss:$0 sm:$0xff] }
 0x5b7   : > { %2295 = vmatpush3.msra.mxu0 %v1682_v2  ;;  %2305 = vmatprep.subr.mxu1 %v2439_v60 }
 0x5b8   : > { %2297 = vmatmul.mubr.msk.f32.vlgmr.msra.gmra.mxu0 %vm1391_vm10, %v1681_v3  ;;  %2307 = vmatprep.mubr.msk.f32.mxu1 %vm2440_vm13, %v2439_v60 }
 0x5b9   : > { %2310 = vmatprep.subr.mxu0 %v2439_v60  ;;  %2318 = vmatprep.mubr.msk.f32.mxu0 %vm2440_vm13, %v2439_v60 }
 0x5ba   : > { %2306 = vmatpush3.msra.mxu1 %v1759_v4  ;;  %2311 = vmatpush3.msra.mxu0 %v1847_v5 }
 0x5bb   : > { %2312 = vmatprep.subr.mxu0 %v2439_v60 }
 0x5bc   : > { %2313 = vmatpush3.msra.mxu0 %v1846_v8 }
 0x5bd   : > { %2314 = vmatprep.subr.mxu0 %v2439_v60 }
 0x5be   : > { %2315 = vmatpush3.msra.mxu0 %v1845_v9 }
 0x5bf   : > { %2316 = vmatprep.subr.mxu0 %v2439_v60 }
 0x5c0   : > { %2317 = vmatpush3.msra.mxu0 %v1844_v10 }
 0x678   : > { %v1755_v6 = vpop.f32.mrf.mxu0 }
 0x679   : > { %2308 = vmatmul.mubr.msk.f32.vlgmr.msra.gmra.mxu1 %vm1391_vm10, %v1755_v6 }
 0x67a   : > { %v2298_v7 = vpop.f32.mrf.mxu0 }
 0x739   : > { %v1839_v12 = vpop.f32.mrf.mxu1 }
 0x73a   : > { %v1840_v13 = vadd.f32 %v2099_v11, %v1839_v12 }
 0x73b   : > { %v2309_v14 = vpop.f32.mrf.mxu1 }
 0x73c   : > { %v1843_v15 = vmax.f32 %v1840_v13, 0.0 }
 0x73e   : > { %2319 = vmatmul.mubr.msk.f32.vlgmr.msra.gmra.mxu0 %vm1391_vm10, %v1843_v15 }
 0x7fe   : > { %v1924_v17 = vpop.f32.mrf.mxu0 }
 0x7ff   : > { %v1925_v18 = vadd.f32 %v2101_v16, %v1924_v17 }
 0x800   : > { %v2320_v19 = vpop.f32.mrf.mxu0 }
 0x801   : > { %v1928_v20 = vmax.f32 %v1925_v18, 0.0 }
 0x803   : > { %1929 = vst [vmem:[%s2842_s0] sm:$0x3] %v1928_v20 }
 0x804 PF: > { %s2843_s28 = sld [smem:[#allocation9_spill]] }
 0x805   : > { %s2844_s21 = sld [smem:[#allocation7_spill]] }
 0x806   : > { %s2845_s22 = sld [smem:[#allocation8_spill]] }
 0x807   : > { %s2846_s23 = sld [smem:[#allocation10_spill]] }
 0x808   : > { %s2847_s24 = sld [smem:[#allocation11_spill]] }
 0x80a   : > { %s26_s25 = sadd.s32 1, %s2843_s28  }
 0x80b   : > { %p23_p1 = scmp.ge.s32.totalorder %s26_s25, 6  }
 0x80d   :  { %25 = sbr.rel (!%p23_p1) target bundleno = 8 (0x8), region = 146 }

</bundles_post_ra>
